<compile_context>
chip_gen: v6e
topology: v6e:2x2x1
jax: 0.10.0
libtpu: 0.0.40
codegen_flags: <defaults>
</compile_context>

<pallas_src>
import functools

import jax
import jax.numpy as jnp
from jax.experimental import pallas as pl
from jax.experimental.pallas import tpu as pltpu


def _final_block_kernel(wb_ref, x_ref, o_ref, *, Wp, KH, KW):
    """One block = Nb images.

    wb_ref: VMEM (Cout, Cin*KH*KW + 1) f32. Columns are (ci, kh, kw) row-major conv
            weights; the last column is the bias.
    x_ref : VMEM (Nb, Cin, F) zero-padded inputs, flattened with row pitch Wp.
    o_ref : VMEM (Nb, Cout, L) pitched outputs, L = H*Wp on the lane axis.
    """
    Nb, Cin, _ = x_ref.shape
    Cout = o_ref.shape[1]
    L = o_ref.shape[2]
    KC = Cin * KH * KW

    wb = wb_ref[...]                      # (Cout, KC+1), tiny, stays in vregs
    bias_col = wb[:, KC:KC + 1]           # (Cout, 1)

    for n in range(Nb):                   # unrolled over images packed in this block
        # All output channels packed onto sublanes of one lane-dense accumulator.
        acc = jnp.zeros((Cout, L), jnp.float32) + bias_col

        # Fully unrolled 3x3 taps: each tap is a shifted ref load of the flattened
        # padded image (vld slots), followed by one full-width broadcast-FMA per input
        # channel that updates every output channel at once.
        for kh in range(KH):
            for kw in range(KW):
                s = kh * Wp + kw
                xs = x_ref[n, :, pl.ds(s, L)].astype(jnp.float32)   # (Cin, L)
                for ci in range(Cin):
                    col = (ci * KH + kh) * KW + kw
                    acc = acc + wb[:, col:col + 1] * xs[ci:ci + 1, :]

        o_ref[n] = jax.nn.sigmoid(acc).astype(o_ref.dtype)          # EUP exp + VPU


def final_block_forward(x_nchw, weight_oikk, bias, *, padding=1, images_per_step=None):
    """sigmoid(conv2d(x, W, b; stride=1, pad=padding)) — matches FinalBlock.forward.

    x_nchw: (N, Cin, H, W); weight_oikk: (Cout, Cin, KH, KW); bias: (Cout,).
    Returns (N, Cout, H, W).
    """
    N, Cin, H, W = x_nchw.shape
    Cout, _, KH, KW = weight_oikk.shape

    # Padded row pitch: conv halo, rounded to a multiple of 8 so the flattened output
    # length L = H*Wp is lane-tile friendly (a multiple of 128 when H % 16 == 0).
    Wp = W + 2 * padding
    Wp = Wp + (-Wp) % 8
    pad_right = Wp - W - padding
    L = H * Wp

    # Bottom halo: enough rows for every flat-shifted tap window, then grow until the
    # flattened padded length F = Hp*Wp is a whole number of 128-lane tiles.
    s_max = (KH - 1) * Wp + (KW - 1)
    Hp = H + padding + max(padding, (KH - 1) - padding)
    while (Hp * Wp) < L + s_max or (Hp * Wp) % 128 != 0:
        Hp += 1
    pad_bottom = Hp - H - padding
    F = Hp * Wp
    assert F >= L + s_max, "padded input too short for flat-shift conv"

    # Grid: at most 2 steps (both v7x TensorCores busy; near-minimal per-step overhead
    # on single-TC v5e/v6e), images packed per step otherwise.
    if images_per_step is None:
        G = min(N, 2)
        Nb = -(-N // G)
    else:
        Nb = max(1, images_per_step)
        G = -(-N // Nb)
    N_pad = G * Nb

    x_pad = jnp.pad(
        x_nchw,
        ((0, N_pad - N), (0, 0), (padding, pad_bottom), (padding, pad_right)),
    )
    x_flat = x_pad.reshape(N_pad, Cin, F)                 # free row-major reshape

    KC = Cin * KH * KW
    wb = jnp.concatenate(
        [weight_oikk.reshape(Cout, KC).astype(jnp.float32),
         bias.reshape(Cout, 1).astype(jnp.float32)],
        axis=1,
    )                                                     # (Cout, KC+1)

    kernel = functools.partial(_final_block_kernel, Wp=Wp, KH=KH, KW=KW)
    itemsize = x_nchw.dtype.itemsize

    out_flat = pl.pallas_call(
        kernel,
        out_shape=jax.ShapeDtypeStruct((N_pad, Cout, L), x_nchw.dtype),
        grid_spec=pltpu.PrefetchScalarGridSpec(
            num_scalar_prefetch=0,
            grid=(G,),
            in_specs=[
                pl.BlockSpec((Cout, KC + 1), lambda g: (0, 0)),    # weights+bias, resident
                pl.BlockSpec((Nb, Cin, F), lambda g: (g, 0, 0)),   # Nb padded images
            ],
            out_specs=pl.BlockSpec((Nb, Cout, L), lambda g: (g, 0, 0)),
        ),
        compiler_params=pltpu.CompilerParams(
            dimension_semantics=("parallel",),      # batch blocks across TCs on v7x
            allow_input_fusion=[False, True],       # let XLA fuse the pad/reshape into input 1
        ),
        cost_estimate=pl.CostEstimate(
            flops=2 * N_pad * L * Cin * Cout * KH * KW,
            transcendentals=N_pad * Cout * L,
            bytes_accessed=(N_pad * Cin * F + N_pad * Cout * L) * itemsize + wb.size * 4,
        ),
    )(wb, x_flat)

    # Row pitch Wp -> W: metadata-only reshape + tiny slice (no transpose).
    return out_flat.reshape(N_pad, Cout, H, Wp)[:N, :, :, :W]


def _reference_forward(x_nchw, weight_oikk, bias, *, padding=1):
    # Pure-JAX reference (XLA conv) for correctness checking.
    y = jax.lax.conv_general_dilated(
        x_nchw,
        weight_oikk,
        window_strides=(1, 1),
        padding=((padding, padding), (padding, padding)),
        dimension_numbers=("NCHW", "OIHW", "NCHW"),
    )
    y = y + bias.reshape(1, -1, 1, 1)
    return jax.nn.sigmoid(y)


if __name__ == "__main__":
    key = jax.random.PRNGKey(0)
    k_x, k_w, k_b = jax.random.split(key, 3)

    N, Cin, H, W = 2, 4, 16, 16
    Cout, KH, KW, pad = 3, 3, 3, 1

    x = jax.random.normal(k_x, (N, Cin, H, W), dtype=jnp.float32)
    # PyTorch Conv2d-style parameter init (shapes (Cout, Cin, KH, KW) and (Cout,)).
    fan_in = Cin * KH * KW
    bound = 1.0 / (fan_in ** 0.5)
    weight = jax.random.uniform(
        k_w, (Cout, Cin, KH, KW), dtype=jnp.float32, minval=-bound, maxval=bound
    )
    bias = jax.random.uniform(
        k_b, (Cout,), dtype=jnp.float32, minval=-bound, maxval=bound
    )

    fwd = jax.jit(functools.partial(final_block_forward, padding=pad))
    out = jax.block_until_ready(fwd(x, weight, bias))

    ref = _reference_forward(x, weight, bias, padding=pad)
    assert out.shape == (N, Cout, H, W)
    assert jnp.allclose(out, ref, atol=1e-5, rtol=1e-5)

    print("KERNEL_OK")
</pallas_src>

<mosaic_0001>
module attributes {stable_mosaic.version = 11 : i64} {
  func.func @_final_block_kernel(%arg0: i32, %arg1: memref<3x37xf32, #tpu.memory_space<vmem>>, %arg2: memref<1x4x768xf32, #tpu.memory_space<vmem>>, %arg3: memref<1x3x384xf32, #tpu.memory_space<vmem>>) attributes {dimension_semantics = [#tpu.dimension_semantics<parallel>], iteration_bounds = array<i64: 2>, scalar_prefetch = 0 : i64, scratch_operands = 0 : i64, tpu.core_type = #tpu.core_type<tc>, window_params = [{pipeline_mode = #tpu.pipeline_mode<synchronous>, transform_indices = @transform_0, window_bounds = array<i64: 3, 37>}, {transform_indices = @transform_1, window_bounds = array<i64: 1, 4, 768>}, {transform_indices = @transform_2, window_bounds = array<i64: 1, 3, 384>}]} {
    %c0 = arith.constant 0 : index
    %c0_0 = arith.constant 0 : index
    %0 = vector.load %arg1[%c0, %c0_0] : memref<3x37xf32, #tpu.memory_space<vmem>>, vector<3x37xf32>
    %1 = vector.extract_strided_slice %0 {offsets = [0, 36], sizes = [3, 1], strides = [1, 1]} : vector<3x37xf32> to vector<3x1xf32>
    %cst = arith.constant 0.000000e+00 : f32
    %2 = vector.broadcast %cst : f32 to vector<3x384xf32>
    %3 = vector.broadcast %1 : vector<3x1xf32> to vector<3x384xf32>
    %4 = arith.addf %2, %3 : vector<3x384xf32>
    %c0_1 = arith.constant 0 : index
    %c0_2 = arith.constant 0 : index
    %c0_3 = arith.constant 0 : index
    %5 = vector.load %arg2[%c0_1, %c0_2, %c0_3] : memref<1x4x768xf32, #tpu.memory_space<vmem>>, vector<1x4x384xf32>
    %6 = vector.shape_cast %5 : vector<1x4x384xf32> to vector<4x384xf32>
    %7 = vector.extract_strided_slice %0 {offsets = [0, 0], sizes = [3, 1], strides = [1, 1]} : vector<3x37xf32> to vector<3x1xf32>
    %8 = vector.extract_strided_slice %6 {offsets = [0, 0], sizes = [1, 384], strides = [1, 1]} : vector<4x384xf32> to vector<1x384xf32>
    %9 = vector.broadcast %7 : vector<3x1xf32> to vector<3x384xf32>
    %10 = vector.broadcast %8 : vector<1x384xf32> to vector<3x384xf32>
    %11 = arith.mulf %9, %10 : vector<3x384xf32>
    %12 = arith.addf %4, %11 : vector<3x384xf32>
    %13 = vector.extract_strided_slice %0 {offsets = [0, 9], sizes = [3, 1], strides = [1, 1]} : vector<3x37xf32> to vector<3x1xf32>
    %14 = vector.extract_strided_slice %6 {offsets = [1, 0], sizes = [1, 384], strides = [1, 1]} : vector<4x384xf32> to vector<1x384xf32>
    %15 = vector.broadcast %13 : vector<3x1xf32> to vector<3x384xf32>
    %16 = vector.broadcast %14 : vector<1x384xf32> to vector<3x384xf32>
    %17 = arith.mulf %15, %16 : vector<3x384xf32>
    %18 = arith.addf %12, %17 : vector<3x384xf32>
    %19 = vector.extract_strided_slice %0 {offsets = [0, 18], sizes = [3, 1], strides = [1, 1]} : vector<3x37xf32> to vector<3x1xf32>
    %20 = vector.extract_strided_slice %6 {offsets = [2, 0], sizes = [1, 384], strides = [1, 1]} : vector<4x384xf32> to vector<1x384xf32>
    %21 = vector.broadcast %19 : vector<3x1xf32> to vector<3x384xf32>
    %22 = vector.broadcast %20 : vector<1x384xf32> to vector<3x384xf32>
    %23 = arith.mulf %21, %22 : vector<3x384xf32>
    %24 = arith.addf %18, %23 : vector<3x384xf32>
    %25 = vector.extract_strided_slice %0 {offsets = [0, 27], sizes = [3, 1], strides = [1, 1]} : vector<3x37xf32> to vector<3x1xf32>
    %26 = vector.extract_strided_slice %6 {offsets = [3, 0], sizes = [1, 384], strides = [1, 1]} : vector<4x384xf32> to vector<1x384xf32>
    %27 = vector.broadcast %25 : vector<3x1xf32> to vector<3x384xf32>
    %28 = vector.broadcast %26 : vector<1x384xf32> to vector<3x384xf32>
    %29 = arith.mulf %27, %28 : vector<3x384xf32>
    %30 = arith.addf %24, %29 : vector<3x384xf32>
    %c0_4 = arith.constant 0 : index
    %c0_5 = arith.constant 0 : index
    %c1 = arith.constant 1 : index
    %31 = vector.load %arg2[%c0_4, %c0_5, %c1] : memref<1x4x768xf32, #tpu.memory_space<vmem>>, vector<1x4x384xf32>
    %32 = vector.shape_cast %31 : vector<1x4x384xf32> to vector<4x384xf32>
    %33 = vector.extract_strided_slice %0 {offsets = [0, 1], sizes = [3, 1], strides = [1, 1]} : vector<3x37xf32> to vector<3x1xf32>
    %34 = vector.extract_strided_slice %32 {offsets = [0, 0], sizes = [1, 384], strides = [1, 1]} : vector<4x384xf32> to vector<1x384xf32>
    %35 = vector.broadcast %33 : vector<3x1xf32> to vector<3x384xf32>
    %36 = vector.broadcast %34 : vector<1x384xf32> to vector<3x384xf32>
    %37 = arith.mulf %35, %36 : vector<3x384xf32>
    %38 = arith.addf %30, %37 : vector<3x384xf32>
    %39 = vector.extract_strided_slice %0 {offsets = [0, 10], sizes = [3, 1], strides = [1, 1]} : vector<3x37xf32> to vector<3x1xf32>
    %40 = vector.extract_strided_slice %32 {offsets = [1, 0], sizes = [1, 384], strides = [1, 1]} : vector<4x384xf32> to vector<1x384xf32>
    %41 = vector.broadcast %39 : vector<3x1xf32> to vector<3x384xf32>
    %42 = vector.broadcast %40 : vector<1x384xf32> to vector<3x384xf32>
    %43 = arith.mulf %41, %42 : vector<3x384xf32>
    %44 = arith.addf %38, %43 : vector<3x384xf32>
    %45 = vector.extract_strided_slice %0 {offsets = [0, 19], sizes = [3, 1], strides = [1, 1]} : vector<3x37xf32> to vector<3x1xf32>
    %46 = vector.extract_strided_slice %32 {offsets = [2, 0], sizes = [1, 384], strides = [1, 1]} : vector<4x384xf32> to vector<1x384xf32>
    %47 = vector.broadcast %45 : vector<3x1xf32> to vector<3x384xf32>
    %48 = vector.broadcast %46 : vector<1x384xf32> to vector<3x384xf32>
    %49 = arith.mulf %47, %48 : vector<3x384xf32>
    %50 = arith.addf %44, %49 : vector<3x384xf32>
    %51 = vector.extract_strided_slice %0 {offsets = [0, 28], sizes = [3, 1], strides = [1, 1]} : vector<3x37xf32> to vector<3x1xf32>
    %52 = vector.extract_strided_slice %32 {offsets = [3, 0], sizes = [1, 384], strides = [1, 1]} : vector<4x384xf32> to vector<1x384xf32>
    %53 = vector.broadcast %51 : vector<3x1xf32> to vector<3x384xf32>
    %54 = vector.broadcast %52 : vector<1x384xf32> to vector<3x384xf32>
    %55 = arith.mulf %53, %54 : vector<3x384xf32>
    %56 = arith.addf %50, %55 : vector<3x384xf32>
    %c0_6 = arith.constant 0 : index
    %c0_7 = arith.constant 0 : index
    %c2 = arith.constant 2 : index
    %57 = vector.load %arg2[%c0_6, %c0_7, %c2] : memref<1x4x768xf32, #tpu.memory_space<vmem>>, vector<1x4x384xf32>
    %58 = vector.shape_cast %57 : vector<1x4x384xf32> to vector<4x384xf32>
    %59 = vector.extract_strided_slice %0 {offsets = [0, 2], sizes = [3, 1], strides = [1, 1]} : vector<3x37xf32> to vector<3x1xf32>
    %60 = vector.extract_strided_slice %58 {offsets = [0, 0], sizes = [1, 384], strides = [1, 1]} : vector<4x384xf32> to vector<1x384xf32>
    %61 = vector.broadcast %59 : vector<3x1xf32> to vector<3x384xf32>
    %62 = vector.broadcast %60 : vector<1x384xf32> to vector<3x384xf32>
    %63 = arith.mulf %61, %62 : vector<3x384xf32>
    %64 = arith.addf %56, %63 : vector<3x384xf32>
    %65 = vector.extract_strided_slice %0 {offsets = [0, 11], sizes = [3, 1], strides = [1, 1]} : vector<3x37xf32> to vector<3x1xf32>
    %66 = vector.extract_strided_slice %58 {offsets = [1, 0], sizes = [1, 384], strides = [1, 1]} : vector<4x384xf32> to vector<1x384xf32>
    %67 = vector.broadcast %65 : vector<3x1xf32> to vector<3x384xf32>
    %68 = vector.broadcast %66 : vector<1x384xf32> to vector<3x384xf32>
    %69 = arith.mulf %67, %68 : vector<3x384xf32>
    %70 = arith.addf %64, %69 : vector<3x384xf32>
    %71 = vector.extract_strided_slice %0 {offsets = [0, 20], sizes = [3, 1], strides = [1, 1]} : vector<3x37xf32> to vector<3x1xf32>
    %72 = vector.extract_strided_slice %58 {offsets = [2, 0], sizes = [1, 384], strides = [1, 1]} : vector<4x384xf32> to vector<1x384xf32>
    %73 = vector.broadcast %71 : vector<3x1xf32> to vector<3x384xf32>
    %74 = vector.broadcast %72 : vector<1x384xf32> to vector<3x384xf32>
    %75 = arith.mulf %73, %74 : vector<3x384xf32>
    %76 = arith.addf %70, %75 : vector<3x384xf32>
    %77 = vector.extract_strided_slice %0 {offsets = [0, 29], sizes = [3, 1], strides = [1, 1]} : vector<3x37xf32> to vector<3x1xf32>
    %78 = vector.extract_strided_slice %58 {offsets = [3, 0], sizes = [1, 384], strides = [1, 1]} : vector<4x384xf32> to vector<1x384xf32>
    %79 = vector.broadcast %77 : vector<3x1xf32> to vector<3x384xf32>
    %80 = vector.broadcast %78 : vector<1x384xf32> to vector<3x384xf32>
    %81 = arith.mulf %79, %80 : vector<3x384xf32>
    %82 = arith.addf %76, %81 : vector<3x384xf32>
    %c0_8 = arith.constant 0 : index
    %c0_9 = arith.constant 0 : index
    %c24 = arith.constant 24 : index
    %83 = vector.load %arg2[%c0_8, %c0_9, %c24] : memref<1x4x768xf32, #tpu.memory_space<vmem>>, vector<1x4x384xf32>
    %84 = vector.shape_cast %83 : vector<1x4x384xf32> to vector<4x384xf32>
    %85 = vector.extract_strided_slice %0 {offsets = [0, 3], sizes = [3, 1], strides = [1, 1]} : vector<3x37xf32> to vector<3x1xf32>
    %86 = vector.extract_strided_slice %84 {offsets = [0, 0], sizes = [1, 384], strides = [1, 1]} : vector<4x384xf32> to vector<1x384xf32>
    %87 = vector.broadcast %85 : vector<3x1xf32> to vector<3x384xf32>
    %88 = vector.broadcast %86 : vector<1x384xf32> to vector<3x384xf32>
    %89 = arith.mulf %87, %88 : vector<3x384xf32>
    %90 = arith.addf %82, %89 : vector<3x384xf32>
    %91 = vector.extract_strided_slice %0 {offsets = [0, 12], sizes = [3, 1], strides = [1, 1]} : vector<3x37xf32> to vector<3x1xf32>
    %92 = vector.extract_strided_slice %84 {offsets = [1, 0], sizes = [1, 384], strides = [1, 1]} : vector<4x384xf32> to vector<1x384xf32>
    %93 = vector.broadcast %91 : vector<3x1xf32> to vector<3x384xf32>
    %94 = vector.broadcast %92 : vector<1x384xf32> to vector<3x384xf32>
    %95 = arith.mulf %93, %94 : vector<3x384xf32>
    %96 = arith.addf %90, %95 : vector<3x384xf32>
    %97 = vector.extract_strided_slice %0 {offsets = [0, 21], sizes = [3, 1], strides = [1, 1]} : vector<3x37xf32> to vector<3x1xf32>
    %98 = vector.extract_strided_slice %84 {offsets = [2, 0], sizes = [1, 384], strides = [1, 1]} : vector<4x384xf32> to vector<1x384xf32>
    %99 = vector.broadcast %97 : vector<3x1xf32> to vector<3x384xf32>
    %100 = vector.broadcast %98 : vector<1x384xf32> to vector<3x384xf32>
    %101 = arith.mulf %99, %100 : vector<3x384xf32>
    %102 = arith.addf %96, %101 : vector<3x384xf32>
    %103 = vector.extract_strided_slice %0 {offsets = [0, 30], sizes = [3, 1], strides = [1, 1]} : vector<3x37xf32> to vector<3x1xf32>
    %104 = vector.extract_strided_slice %84 {offsets = [3, 0], sizes = [1, 384], strides = [1, 1]} : vector<4x384xf32> to vector<1x384xf32>
    %105 = vector.broadcast %103 : vector<3x1xf32> to vector<3x384xf32>
    %106 = vector.broadcast %104 : vector<1x384xf32> to vector<3x384xf32>
    %107 = arith.mulf %105, %106 : vector<3x384xf32>
    %108 = arith.addf %102, %107 : vector<3x384xf32>
    %c0_10 = arith.constant 0 : index
    %c0_11 = arith.constant 0 : index
    %c25 = arith.constant 25 : index
    %109 = vector.load %arg2[%c0_10, %c0_11, %c25] : memref<1x4x768xf32, #tpu.memory_space<vmem>>, vector<1x4x384xf32>
    %110 = vector.shape_cast %109 : vector<1x4x384xf32> to vector<4x384xf32>
    %111 = vector.extract_strided_slice %0 {offsets = [0, 4], sizes = [3, 1], strides = [1, 1]} : vector<3x37xf32> to vector<3x1xf32>
    %112 = vector.extract_strided_slice %110 {offsets = [0, 0], sizes = [1, 384], strides = [1, 1]} : vector<4x384xf32> to vector<1x384xf32>
    %113 = vector.broadcast %111 : vector<3x1xf32> to vector<3x384xf32>
    %114 = vector.broadcast %112 : vector<1x384xf32> to vector<3x384xf32>
    %115 = arith.mulf %113, %114 : vector<3x384xf32>
    %116 = arith.addf %108, %115 : vector<3x384xf32>
    %117 = vector.extract_strided_slice %0 {offsets = [0, 13], sizes = [3, 1], strides = [1, 1]} : vector<3x37xf32> to vector<3x1xf32>
    %118 = vector.extract_strided_slice %110 {offsets = [1, 0], sizes = [1, 384], strides = [1, 1]} : vector<4x384xf32> to vector<1x384xf32>
    %119 = vector.broadcast %117 : vector<3x1xf32> to vector<3x384xf32>
    %120 = vector.broadcast %118 : vector<1x384xf32> to vector<3x384xf32>
    %121 = arith.mulf %119, %120 : vector<3x384xf32>
    %122 = arith.addf %116, %121 : vector<3x384xf32>
    %123 = vector.extract_strided_slice %0 {offsets = [0, 22], sizes = [3, 1], strides = [1, 1]} : vector<3x37xf32> to vector<3x1xf32>
    %124 = vector.extract_strided_slice %110 {offsets = [2, 0], sizes = [1, 384], strides = [1, 1]} : vector<4x384xf32> to vector<1x384xf32>
    %125 = vector.broadcast %123 : vector<3x1xf32> to vector<3x384xf32>
    %126 = vector.broadcast %124 : vector<1x384xf32> to vector<3x384xf32>
    %127 = arith.mulf %125, %126 : vector<3x384xf32>
    %128 = arith.addf %122, %127 : vector<3x384xf32>
    %129 = vector.extract_strided_slice %0 {offsets = [0, 31], sizes = [3, 1], strides = [1, 1]} : vector<3x37xf32> to vector<3x1xf32>
    %130 = vector.extract_strided_slice %110 {offsets = [3, 0], sizes = [1, 384], strides = [1, 1]} : vector<4x384xf32> to vector<1x384xf32>
    %131 = vector.broadcast %129 : vector<3x1xf32> to vector<3x384xf32>
    %132 = vector.broadcast %130 : vector<1x384xf32> to vector<3x384xf32>
    %133 = arith.mulf %131, %132 : vector<3x384xf32>
    %134 = arith.addf %128, %133 : vector<3x384xf32>
    %c0_12 = arith.constant 0 : index
    %c0_13 = arith.constant 0 : index
    %c26 = arith.constant 26 : index
    %135 = vector.load %arg2[%c0_12, %c0_13, %c26] : memref<1x4x768xf32, #tpu.memory_space<vmem>>, vector<1x4x384xf32>
    %136 = vector.shape_cast %135 : vector<1x4x384xf32> to vector<4x384xf32>
    %137 = vector.extract_strided_slice %0 {offsets = [0, 5], sizes = [3, 1], strides = [1, 1]} : vector<3x37xf32> to vector<3x1xf32>
    %138 = vector.extract_strided_slice %136 {offsets = [0, 0], sizes = [1, 384], strides = [1, 1]} : vector<4x384xf32> to vector<1x384xf32>
    %139 = vector.broadcast %137 : vector<3x1xf32> to vector<3x384xf32>
    %140 = vector.broadcast %138 : vector<1x384xf32> to vector<3x384xf32>
    %141 = arith.mulf %139, %140 : vector<3x384xf32>
    %142 = arith.addf %134, %141 : vector<3x384xf32>
    %143 = vector.extract_strided_slice %0 {offsets = [0, 14], sizes = [3, 1], strides = [1, 1]} : vector<3x37xf32> to vector<3x1xf32>
    %144 = vector.extract_strided_slice %136 {offsets = [1, 0], sizes = [1, 384], strides = [1, 1]} : vector<4x384xf32> to vector<1x384xf32>
    %145 = vector.broadcast %143 : vector<3x1xf32> to vector<3x384xf32>
    %146 = vector.broadcast %144 : vector<1x384xf32> to vector<3x384xf32>
    %147 = arith.mulf %145, %146 : vector<3x384xf32>
    %148 = arith.addf %142, %147 : vector<3x384xf32>
    %149 = vector.extract_strided_slice %0 {offsets = [0, 23], sizes = [3, 1], strides = [1, 1]} : vector<3x37xf32> to vector<3x1xf32>
    %150 = vector.extract_strided_slice %136 {offsets = [2, 0], sizes = [1, 384], strides = [1, 1]} : vector<4x384xf32> to vector<1x384xf32>
    %151 = vector.broadcast %149 : vector<3x1xf32> to vector<3x384xf32>
    %152 = vector.broadcast %150 : vector<1x384xf32> to vector<3x384xf32>
    %153 = arith.mulf %151, %152 : vector<3x384xf32>
    %154 = arith.addf %148, %153 : vector<3x384xf32>
    %155 = vector.extract_strided_slice %0 {offsets = [0, 32], sizes = [3, 1], strides = [1, 1]} : vector<3x37xf32> to vector<3x1xf32>
    %156 = vector.extract_strided_slice %136 {offsets = [3, 0], sizes = [1, 384], strides = [1, 1]} : vector<4x384xf32> to vector<1x384xf32>
    %157 = vector.broadcast %155 : vector<3x1xf32> to vector<3x384xf32>
    %158 = vector.broadcast %156 : vector<1x384xf32> to vector<3x384xf32>
    %159 = arith.mulf %157, %158 : vector<3x384xf32>
    %160 = arith.addf %154, %159 : vector<3x384xf32>
    %c0_14 = arith.constant 0 : index
    %c0_15 = arith.constant 0 : index
    %c48 = arith.constant 48 : index
    %161 = vector.load %arg2[%c0_14, %c0_15, %c48] : memref<1x4x768xf32, #tpu.memory_space<vmem>>, vector<1x4x384xf32>
    %162 = vector.shape_cast %161 : vector<1x4x384xf32> to vector<4x384xf32>
    %163 = vector.extract_strided_slice %0 {offsets = [0, 6], sizes = [3, 1], strides = [1, 1]} : vector<3x37xf32> to vector<3x1xf32>
    %164 = vector.extract_strided_slice %162 {offsets = [0, 0], sizes = [1, 384], strides = [1, 1]} : vector<4x384xf32> to vector<1x384xf32>
    %165 = vector.broadcast %163 : vector<3x1xf32> to vector<3x384xf32>
    %166 = vector.broadcast %164 : vector<1x384xf32> to vector<3x384xf32>
    %167 = arith.mulf %165, %166 : vector<3x384xf32>
    %168 = arith.addf %160, %167 : vector<3x384xf32>
    %169 = vector.extract_strided_slice %0 {offsets = [0, 15], sizes = [3, 1], strides = [1, 1]} : vector<3x37xf32> to vector<3x1xf32>
    %170 = vector.extract_strided_slice %162 {offsets = [1, 0], sizes = [1, 384], strides = [1, 1]} : vector<4x384xf32> to vector<1x384xf32>
    %171 = vector.broadcast %169 : vector<3x1xf32> to vector<3x384xf32>
    %172 = vector.broadcast %170 : vector<1x384xf32> to vector<3x384xf32>
    %173 = arith.mulf %171, %172 : vector<3x384xf32>
    %174 = arith.addf %168, %173 : vector<3x384xf32>
    %175 = vector.extract_strided_slice %0 {offsets = [0, 24], sizes = [3, 1], strides = [1, 1]} : vector<3x37xf32> to vector<3x1xf32>
    %176 = vector.extract_strided_slice %162 {offsets = [2, 0], sizes = [1, 384], strides = [1, 1]} : vector<4x384xf32> to vector<1x384xf32>
    %177 = vector.broadcast %175 : vector<3x1xf32> to vector<3x384xf32>
    %178 = vector.broadcast %176 : vector<1x384xf32> to vector<3x384xf32>
    %179 = arith.mulf %177, %178 : vector<3x384xf32>
    %180 = arith.addf %174, %179 : vector<3x384xf32>
    %181 = vector.extract_strided_slice %0 {offsets = [0, 33], sizes = [3, 1], strides = [1, 1]} : vector<3x37xf32> to vector<3x1xf32>
    %182 = vector.extract_strided_slice %162 {offsets = [3, 0], sizes = [1, 384], strides = [1, 1]} : vector<4x384xf32> to vector<1x384xf32>
    %183 = vector.broadcast %181 : vector<3x1xf32> to vector<3x384xf32>
    %184 = vector.broadcast %182 : vector<1x384xf32> to vector<3x384xf32>
    %185 = arith.mulf %183, %184 : vector<3x384xf32>
    %186 = arith.addf %180, %185 : vector<3x384xf32>
    %c0_16 = arith.constant 0 : index
    %c0_17 = arith.constant 0 : index
    %c49 = arith.constant 49 : index
    %187 = vector.load %arg2[%c0_16, %c0_17, %c49] : memref<1x4x768xf32, #tpu.memory_space<vmem>>, vector<1x4x384xf32>
    %188 = vector.shape_cast %187 : vector<1x4x384xf32> to vector<4x384xf32>
    %189 = vector.extract_strided_slice %0 {offsets = [0, 7], sizes = [3, 1], strides = [1, 1]} : vector<3x37xf32> to vector<3x1xf32>
    %190 = vector.extract_strided_slice %188 {offsets = [0, 0], sizes = [1, 384], strides = [1, 1]} : vector<4x384xf32> to vector<1x384xf32>
    %191 = vector.broadcast %189 : vector<3x1xf32> to vector<3x384xf32>
    %192 = vector.broadcast %190 : vector<1x384xf32> to vector<3x384xf32>
    %193 = arith.mulf %191, %192 : vector<3x384xf32>
    %194 = arith.addf %186, %193 : vector<3x384xf32>
    %195 = vector.extract_strided_slice %0 {offsets = [0, 16], sizes = [3, 1], strides = [1, 1]} : vector<3x37xf32> to vector<3x1xf32>
    %196 = vector.extract_strided_slice %188 {offsets = [1, 0], sizes = [1, 384], strides = [1, 1]} : vector<4x384xf32> to vector<1x384xf32>
    %197 = vector.broadcast %195 : vector<3x1xf32> to vector<3x384xf32>
    %198 = vector.broadcast %196 : vector<1x384xf32> to vector<3x384xf32>
    %199 = arith.mulf %197, %198 : vector<3x384xf32>
    %200 = arith.addf %194, %199 : vector<3x384xf32>
    %201 = vector.extract_strided_slice %0 {offsets = [0, 25], sizes = [3, 1], strides = [1, 1]} : vector<3x37xf32> to vector<3x1xf32>
    %202 = vector.extract_strided_slice %188 {offsets = [2, 0], sizes = [1, 384], strides = [1, 1]} : vector<4x384xf32> to vector<1x384xf32>
    %203 = vector.broadcast %201 : vector<3x1xf32> to vector<3x384xf32>
    %204 = vector.broadcast %202 : vector<1x384xf32> to vector<3x384xf32>
    %205 = arith.mulf %203, %204 : vector<3x384xf32>
    %206 = arith.addf %200, %205 : vector<3x384xf32>
    %207 = vector.extract_strided_slice %0 {offsets = [0, 34], sizes = [3, 1], strides = [1, 1]} : vector<3x37xf32> to vector<3x1xf32>
    %208 = vector.extract_strided_slice %188 {offsets = [3, 0], sizes = [1, 384], strides = [1, 1]} : vector<4x384xf32> to vector<1x384xf32>
    %209 = vector.broadcast %207 : vector<3x1xf32> to vector<3x384xf32>
    %210 = vector.broadcast %208 : vector<1x384xf32> to vector<3x384xf32>
    %211 = arith.mulf %209, %210 : vector<3x384xf32>
    %212 = arith.addf %206, %211 : vector<3x384xf32>
    %c0_18 = arith.constant 0 : index
    %c0_19 = arith.constant 0 : index
    %c50 = arith.constant 50 : index
    %213 = vector.load %arg2[%c0_18, %c0_19, %c50] : memref<1x4x768xf32, #tpu.memory_space<vmem>>, vector<1x4x384xf32>
    %214 = vector.shape_cast %213 : vector<1x4x384xf32> to vector<4x384xf32>
    %215 = vector.extract_strided_slice %0 {offsets = [0, 8], sizes = [3, 1], strides = [1, 1]} : vector<3x37xf32> to vector<3x1xf32>
    %216 = vector.extract_strided_slice %214 {offsets = [0, 0], sizes = [1, 384], strides = [1, 1]} : vector<4x384xf32> to vector<1x384xf32>
    %217 = vector.broadcast %215 : vector<3x1xf32> to vector<3x384xf32>
    %218 = vector.broadcast %216 : vector<1x384xf32> to vector<3x384xf32>
    %219 = arith.mulf %217, %218 : vector<3x384xf32>
    %220 = arith.addf %212, %219 : vector<3x384xf32>
    %221 = vector.extract_strided_slice %0 {offsets = [0, 17], sizes = [3, 1], strides = [1, 1]} : vector<3x37xf32> to vector<3x1xf32>
    %222 = vector.extract_strided_slice %214 {offsets = [1, 0], sizes = [1, 384], strides = [1, 1]} : vector<4x384xf32> to vector<1x384xf32>
    %223 = vector.broadcast %221 : vector<3x1xf32> to vector<3x384xf32>
    %224 = vector.broadcast %222 : vector<1x384xf32> to vector<3x384xf32>
    %225 = arith.mulf %223, %224 : vector<3x384xf32>
    %226 = arith.addf %220, %225 : vector<3x384xf32>
    %227 = vector.extract_strided_slice %0 {offsets = [0, 26], sizes = [3, 1], strides = [1, 1]} : vector<3x37xf32> to vector<3x1xf32>
    %228 = vector.extract_strided_slice %214 {offsets = [2, 0], sizes = [1, 384], strides = [1, 1]} : vector<4x384xf32> to vector<1x384xf32>
    %229 = vector.broadcast %227 : vector<3x1xf32> to vector<3x384xf32>
    %230 = vector.broadcast %228 : vector<1x384xf32> to vector<3x384xf32>
    %231 = arith.mulf %229, %230 : vector<3x384xf32>
    %232 = arith.addf %226, %231 : vector<3x384xf32>
    %233 = vector.extract_strided_slice %0 {offsets = [0, 35], sizes = [3, 1], strides = [1, 1]} : vector<3x37xf32> to vector<3x1xf32>
    %234 = vector.extract_strided_slice %214 {offsets = [3, 0], sizes = [1, 384], strides = [1, 1]} : vector<4x384xf32> to vector<1x384xf32>
    %235 = vector.broadcast %233 : vector<3x1xf32> to vector<3x384xf32>
    %236 = vector.broadcast %234 : vector<1x384xf32> to vector<3x384xf32>
    %237 = arith.mulf %235, %236 : vector<3x384xf32>
    %238 = arith.addf %232, %237 : vector<3x384xf32>
    %239 = arith.negf %238 : vector<3x384xf32>
    %240 = math.exp %239 : vector<3x384xf32>
    %cst_20 = arith.constant 1.000000e+00 : f32
    %241 = vector.broadcast %cst_20 : f32 to vector<3x384xf32>
    %242 = arith.addf %241, %240 : vector<3x384xf32>
    %243 = arith.divf %241, %242 : vector<3x384xf32>
    %c0_21 = arith.constant 0 : index
    %c0_22 = arith.constant 0 : index
    %c0_23 = arith.constant 0 : index
    %244 = vector.load %arg3[%c0_21, %c0_22, %c0_23] : memref<1x3x384xf32, #tpu.memory_space<vmem>>, vector<1x3x384xf32>
    %245 = vector.shape_cast %244 : vector<1x3x384xf32> to vector<3x384xf32>
    %246 = vector.shape_cast %243 : vector<3x384xf32> to vector<1x3x384xf32>
    tpu.vector_store %arg3[%c0_21, %c0_22, %c0_23], %246 {strides = array<i32>} : memref<1x3x384xf32, #tpu.memory_space<vmem>>, vector<1x3x384xf32>,
    return
  }
  func.func @transform_0(%arg0: i32) -> (i32, i32) {
    %c0_i32 = arith.constant 0 : i32
    %c0_i32_0 = arith.constant 0 : i32
    %c0_i32_1 = arith.constant 0 : i32
    return %c0_i32, %c0_i32_0 : i32, i32
  }
  func.func @transform_1(%arg0: i32) -> (i32, i32, i32) {
    %c0_i32 = arith.constant 0 : i32
    %c0_i32_0 = arith.constant 0 : i32
    %c0_i32_1 = arith.constant 0 : i32
    return %arg0, %c0_i32, %c0_i32_0 : i32, i32, i32
  }
  func.func @transform_2(%arg0: i32) -> (i32, i32, i32) {
    %c0_i32 = arith.constant 0 : i32
    %c0_i32_0 = arith.constant 0 : i32
    %c0_i32_1 = arith.constant 0 : i32
    return %arg0, %c0_i32, %c0_i32_0 : i32, i32, i32
  }
}

</mosaic_0001>

<bundles_post_ra>
// kernel: final_block_forward.1
= control target key start
LH: loop header
LB: loop body
LE: loop exit
PB: predicated region body
PF: predicated region fallthrough
CT: control target
= control target key end

     0   :  { %s1650_s9 = smov 0   ;;  %s2364_s0 = inlined_call_operand.vmem [shape: f32[3,37], index: 0, kind: input, shape index: {}]   ;;  %s2365_s1 = inlined_call_operand.vmem [shape: f32[2,4,768], index: 1, kind: input, shape index: {}]   ;;  %s2366_s2 = inlined_call_operand.vmem [shape: f32[2,3,384], index: 2, kind: output, shape index: {}]  }
   0x1 LB: > { %s1466_s10 = sadd.s32 4294967295, %s1588_s9   ;;  %p1470_p0 = scmp.ge.s32.totalorder %s1588_s9, 1  ;;  %s1588_s9 = sphi %s1650_s9, %s12_s9  }
   0x2   : > { %p112_p1 = scmp.lt.s32.totalorder %s1588_s9, 3 }
   0x4   : > { %p113_p2 = pnand %p1470_p0, %p112_p1 }
   0x6   : > { %116 = sbr.rel (%p113_p2) target bundleno = 1383 (0x567), region = 28 }
   0xb   : > { %v1661_v0 = vld [vmem:[%s2364_s0] sm:$0x7]  ;;  %v1590_v1 = vmov 36   ;;  %v1591_v2 = vmov 9   ;;  %p134_p3 = scmp.lt.s32.totalorder %s1466_s10, 1  ;;  %v159_v3 = vlaneseq  ;;  %v1592_v5 = vmov 0  }
   0xc   : > { %1533 = vset.pattern.permute.xlu0 %v1590_v1  ;;  %1535 = vset.pattern.permute.xlu1 %v1591_v2  ;;  %v1593_v6 = vmov 18   ;;  %v1594_v14 = vmov 1   ;;  %v1595_v15 = vmov 27   ;;  %v1596_v21 = vmov 10   ;;  %s1606_s17 = smov 127   ;;  %s1607_s18 = smov 126  }
   0xd   : > { %147 = vperm.xlu0 %1533, %v1661_v0   ;;  %193 = vperm.xlu1 %1535, %v1661_v0   ;;  %s2384_s10 = smov (!%p134_p3, %s1466_s10), 1  ;;  %v1667_v4 = vshrl.u32 %v159_v3, 7  ;;  %v1597_v23 = vmov 19   ;;  %v1598_v24 = vmov 28   ;;  %v1599_v25 = vmov 2   ;;  %s1608_s19 = smov 104  }
   0xe   : > { %s1478_s13 = smul.u32 24, %s2384_s10  ;;  %v1600_v26 = vmov 11   ;;  %v1601_v27 = vmov 20   ;;  %v1602_v28 = vmov 29   ;;  %v1603_v29 = vmov 3   ;;  %s1612_s20 = smov 103  }
   0xf   : > { %v1673_v7 = vsub.s32 1, %v1667_v4  ;;  %v1681_v8 = vsub.s32 0, %v1667_v4  ;;  %v1686_v11 = vsub.s32 2, %v1667_v4  ;;  %v1690_v13 = vsub.s32 3, %v1667_v4  ;;  %s1631_s21 = smov 102   ;;  %s1632_s22 = smov 80  }
  0x10   : > { %s1678_s16 = scalar_lea.vmem %s2365_s1, %s1478_s13  ;;  %v1604_v30 = vmov 12   ;;  %v1605_v31 = vmov 21   ;;  %v165_v40 = vsub.s32 4, %v1667_v4  ;;  %v202_v3 = vsub.s32 5, %v1667_v4  ;;  %s1633_s23 = smov 79  }
  0x11   : > { %1534 = vset.pattern.permute.xlu0 %v1592_v5  ;;  %1536 = vset.pattern.permute.xlu1 %v1593_v6  ;;  %v152_v9 = vld [vmem:[%s1678_s16 + $0x8] sm:$0xf]  ;;  %v1717_v35 = vld [vmem:[%s1678_s16] sm:$0xff]  ;;  %vm363_vm0 = vcmask 1039360   ;;  %vm588_vm1 = vcmask 1031168   ;;  %vm705_vm2 = vcmask 850944  }
  0x12   : > { %154 = vperm.xlu0 %1534, %v1661_v0   ;;  %230 = vperm.xlu1 %1536, %v1661_v0   ;;  %v207_v10 = vrot.slane %v152_v9, %v1673_v7  ;;  %v170_v12 = vrot.slane %v152_v9, %v1681_v8  ;;  %v244_v18 = vrot.slane %v152_v9, %v1686_v11  ;;  %v1714_v34 = vld [vmem:[%s1678_s16 + $0x8] sm:$0xff]  ;;  %vm822_vm3 = vcmask 842752   ;;  %s1634_s24 = smov 78   ;;  %s1479_s25 = smul.u32 12, %s2384_s10 }
  0x13   : > { %v281_v19 = vrot.slane %v152_v9, %v1690_v13  ;;  %v322_v36 = vrot.slane %v1714_v34, %v1681_v8  ;;  %v162_v41 = vrot.slane %v1717_v35, %v1681_v8  ;;  %v388_v46 = vrot.slane %v1714_v34, %v1673_v7 }
  0x14   : > { %v222_v16 = vrot.slane %v207_v10, %v1673_v7  ;;  %v185_v17 = vrot.slane %v170_v12, %v1681_v8  ;;  %v259_v20 = vrot.slane %v244_v18, %v1686_v11  ;;  %v166_v47 = vrot.slane %v1717_v35, %v165_v40  ;;  %s143_s28 = scalar_lea.vmem %s2366_s2, %s1479_s25 }
  0x15   : > { %v296_v22 = vrot.slane %v281_v19, %v1690_v13  ;;  %v1731_v43 = vrot.slane %v322_v36, %v1681_v8  ;;  %v1739_v48 = vrot.slane %v162_v41, %v1681_v8  ;;  %v1747_v56 = vrot.slane %v388_v46, %v1673_v7 }
  0x16   : > { %1538 = vset.pattern.permute.xlu0 %v1594_v14  ;;  %1537 = vset.pattern.permute.xlu1 %v1595_v15  ;;  %v326_v57 = vrot.slane %v1714_v34, %v165_v40  ;;  %v453_v58 = vrot.slane %v1714_v34, %v1686_v11  ;;  %v1754_v59 = vrot.slane %v166_v47, %v1681_v8  ;;  %vm939_vm4 = vcmask 834560  }
  0x17   : > { %306 = vperm.xlu0 %1538, %v1661_v0   ;;  %267 = vperm.xlu1 %1537, %v1661_v0   ;;  %v199_v5 = vrot.slane %v1717_v35, %v1673_v7  ;;  %v518_v6 = vrot.slane %v1714_v34, %v1690_v13  ;;  %v203_v12 = vrot.slane %v1717_v35, %v202_v3  ;;  %vm1056_vm5 = vcmask 654336  }
  0x18   : > { %v1762_v1 = vrot.slane %v326_v57, %v1681_v8  ;;  %v1765_v2 = vrot.slane %v453_v58, %v1686_v11  ;;  %v273_v46 = vrot.slane %v1717_v35, %v1690_v13  ;;  %vm1173_vm6 = vcmask 646144  }
  0x19   : > { %v1778_v14 = vrot.slane %v199_v5, %v1673_v7  ;;  %v1782_v15 = vrot.slane %v518_v6, %v1690_v13  ;;  %v1788_v19 = vrot.slane %v203_v12, %v1673_v7  ;;  %vm1290_vm7 = vcmask 637952  }
  0x1b   : > { %1539 = vset.pattern.permute.xlu0 %v1596_v21 }
  0x1c   : > { %374 = vperm.xlu0 %1539, %v1661_v0  }
  0x20   : > { %1540 = vset.pattern.permute.xlu0 %v1597_v23  ;;  %v239_v23 = vsub.s32 6, %v1667_v4 }
  0x21   : > { %439 = vperm.xlu0 %1540, %v1661_v0  }
  0x22   : > { %v457_v36 = vrot.slane %v1714_v34, %v239_v23 }
  0x25   : > { %1541 = vset.pattern.permute.xlu0 %v1598_v24  ;;  %v236_v24 = vrot.slane %v1717_v35, %v1686_v11 }
  0x26   : > { %504 = vperm.xlu0 %1541, %v1661_v0  }
  0x2a   : > { %1542 = vset.pattern.permute.xlu0 %v1599_v25 }
  0x2b   : > { %569 = vperm.xlu0 %1542, %v1661_v0  }
  0x2f   : > { %1543 = vset.pattern.permute.xlu0 %v1600_v26 }
  0x30   : > { %599 = vperm.xlu0 %1543, %v1661_v0  }
  0x34   : > { %1544 = vset.pattern.permute.xlu0 %v1601_v27 }
  0x35   : > { %628 = vperm.xlu0 %1544, %v1661_v0  }
  0x39   : > { %1545 = vset.pattern.permute.xlu0 %v1602_v28  ;;  %v240_v28 = vrot.slane %v1717_v35, %v239_v23 }
  0x3a   : > { %657 = vperm.xlu0 %1545, %v1661_v0  }
  0x3e   : > { %1546 = vset.pattern.permute.xlu0 %v1603_v29 }
  0x3f   : > { %686 = vperm.xlu0 %1546, %v1661_v0  }
  0x43   : > { %1547 = vset.pattern.permute.xlu0 %v1604_v30 }
  0x44   : > { %716 = vperm.xlu0 %1547, %v1661_v0  }
  0x48   : > { %1548 = vset.pattern.permute.xlu0 %v1605_v31 }
  0x88   : > { %v1709_v32 = vpop.permute.xlu0 %147  ;;  %v1711_v33 = vpop.permute.xlu1 %193 }
  0x89   : > { %v225_v39 = vmul.f32 %v222_v16, %v1711_v33 }
  0x8d   : > { %v1721_v37 = vpop.permute.xlu0 %154  ;;  %v1723_v38 = vpop.permute.xlu1 %230 }
  0x8e   : > { %v188_v42 = vmul.f32 %v185_v17, %v1721_v37  ;;  %v262_v45 = vmul.f32 %v259_v20, %v1723_v38  ;;  %v392_v17 = vrot.slane %v1714_v34, %v202_v3  ;;  %v1609_v3 = vmov 30  }
  0x90   : > { %v191_v44 = vadd.f32 %v188_v42, %v1709_v32  ;;  %v1819_v42 = vrot.slane %v457_v36, %v1686_v11 }
  0x92   : > { %v228_v49 = vadd.f32 %v225_v39, %v191_v44  ;;  %v307_v50 = vpop.permute.xlu0 %306  ;;  %v1741_v51 = vpop.permute.xlu1 %267  ;;  %v1813_v39 = vrot.slane %v240_v28, %v1686_v11 }
  0x93   : > { %v299_v52 = vmul.f32 %v296_v22, %v1741_v51  ;;  %v349_v53 = vmul.f32 %v1731_v43, %v307_v50  ;;  %v347_v55 = vmul.f32 %v307_v50, %v1739_v48  ;;  %v348_v62 = vmul.f32 %v307_v50, %v1754_v59 }
  0x94   : > { %v265_v54 = vadd.f32 %v262_v45, %v228_v49  ;;  %v350_v10 = vmul.f32 %v1762_v1, %v307_v50  ;;  %v1795_v22 = vrot.slane %v392_v17, %v1673_v7  ;;  %v1806_v7 = vrot.slane %v236_v24, %v1686_v11 }
  0x95   : > { %359 = vrot.lane.b32.xlu0 %v349_v53, %s1606_s17  ;;  %355 = vrot.lane.b32.xlu1 %v347_v55, %s1606_s17  ;;  %v276_v45 = vsub.s32 7, %v1667_v4 }
  0x96   : > { %v1756_v60 = vadd.f32 %v299_v52, %v265_v54  ;;  %v1830_v52 = vrot.slane %v273_v46, %v1690_v13 }
  0x97   : > { %v375_v61 = vpop.permute.xlu0 %374  ;;  %v277_v50 = vrot.slane %v1717_v35, %v276_v45  ;;  %v522_v53 = vrot.slane %v1714_v34, %v276_v45 }
  0x98   : > { %v415_v63 = vmul.f32 %v1747_v56, %v375_v61  ;;  %v413_v16 = vmul.f32 %v375_v61, %v1778_v14  ;;  %v414_v21 = vmul.f32 %v375_v61, %v1788_v19  ;;  %v416_v27 = vmul.f32 %v1795_v22, %v375_v61 }
  0x99   : > { %357 = vrot.lane.b32.xlu1 %v348_v62, %s1606_s17  ;;  %v1838_v54 = vrot.slane %v277_v50, %v1690_v13  ;;  %v1844_v58 = vrot.slane %v522_v53, %v1690_v13 }
  0x9a   : > { %425 = vrot.lane.b32.xlu0 %v415_v63, %s1606_s17 }
  0x9c   : > { %v440_v9 = vpop.permute.xlu0 %439 }
  0x9d   : > { %v480_v8 = vmul.f32 %v1765_v2, %v440_v9  ;;  %361 = vrot.lane.b32.xlu1 %v350_v10, %s1606_s17  ;;  %v478_v30 = vmul.f32 %v440_v9, %v1806_v7  ;;  %v479_v41 = vmul.f32 %v440_v9, %v1813_v39  ;;  %v481_v47 = vmul.f32 %v1819_v42, %v440_v9 }
  0x9f   : > { %490 = vrot.lane.b32.xlu0 %v480_v8, %s1606_s17 }
  0xa1   : > { %v505_v18 = vpop.permute.xlu0 %504  ;;  %421 = vrot.lane.b32.xlu1 %v413_v16, %s1606_s17 }
  0xa2   : > { %v545_v20 = vmul.f32 %v1782_v15, %v505_v18  ;;  %v543_v4 = vmul.f32 %v505_v18, %v1830_v52  ;;  %v544_v57 = vmul.f32 %v505_v18, %v1838_v54  ;;  %v546_v34 = vmul.f32 %v1844_v58, %v505_v18 }
  0xa4   : > { %555 = vrot.lane.b32.xlu0 %v545_v20, %s1606_s17 }
  0xa5   : > { %423 = vrot.lane.b32.xlu1 %v414_v21, %s1606_s17 }
  0xa6   : > { %v570_v25 = vpop.permute.xlu0 %569 }
  0xa7   : > { %v574_v26 = vmul.f32 %v570_v25, %v1731_v43  ;;  %v572_v63 = vmul.f32 %v570_v25, %v1739_v48  ;;  %v573_v13 = vmul.f32 %v570_v25, %v1754_v59  ;;  %v575_v5 = vmul.f32 %v570_v25, %v1762_v1 }
  0xa9   : > { %584 = vrot.lane.b32.xlu0 %v574_v26, %s1607_s18  ;;  %427 = vrot.lane.b32.xlu1 %v416_v27, %s1606_s17 }
  0xab   : > { %v600_v29 = vpop.permute.xlu0 %599 }
  0xac   : > { %v604_v31 = vmul.f32 %v600_v29, %v1747_v56  ;;  %v602_v6 = vmul.f32 %v600_v29, %v1778_v14  ;;  %v603_v9 = vmul.f32 %v600_v29, %v1788_v19  ;;  %v605_v10 = vmul.f32 %v600_v29, %v1795_v22 }
  0xad   : > { %486 = vrot.lane.b32.xlu1 %v478_v30, %s1606_s17 }
  0xae   : > { %614 = vrot.lane.b32.xlu0 %v604_v31, %s1607_s18 }
  0xb0   : > { %v629_v40 = vpop.permute.xlu0 %628 }
  0xb1   : > { %v633_v44 = vmul.f32 %v629_v40, %v1765_v2  ;;  %488 = vrot.lane.b32.xlu1 %v479_v41, %s1606_s17  ;;  %v631_v8 = vmul.f32 %v629_v40, %v1806_v7  ;;  %v632_v12 = vmul.f32 %v629_v40, %v1813_v39  ;;  %v634_v16 = vmul.f32 %v629_v40, %v1819_v42 }
  0xb3   : > { %643 = vrot.lane.b32.xlu0 %v633_v44, %s1607_s18 }
  0xb5   : > { %v658_v49 = vpop.permute.xlu0 %657  ;;  %492 = vrot.lane.b32.xlu1 %v481_v47, %s1606_s17 }
  0xb6   : > { %v662_v11 = vmul.f32 %v658_v49, %v1782_v15  ;;  %v660_v17 = vmul.f32 %v658_v49, %v1830_v52  ;;  %v661_v18 = vmul.f32 %v658_v49, %v1838_v54  ;;  %v663_v20 = vmul.f32 %v658_v49, %v1844_v58 }
  0xb8   : > { %672 = vrot.lane.b32.xlu0 %v662_v11, %s1607_s18 }
  0xb9   : > { %551 = vrot.lane.b32.xlu1 %v543_v4, %s1606_s17 }
  0xba   : > { %v687_v55 = vpop.permute.xlu0 %686 }
  0xbb   : > { %v691_v35 = vmul.f32 %v687_v55, %v1731_v43  ;;  %v689_v21 = vmul.f32 %v687_v55, %v1739_v48  ;;  %v690_v23 = vmul.f32 %v687_v55, %v1754_v59  ;;  %v692_v24 = vmul.f32 %v687_v55, %v1762_v1 }
  0xbd   : > { %701 = vrot.lane.b32.xlu0 %v691_v35, %s1608_s19  ;;  %553 = vrot.lane.b32.xlu1 %v544_v57, %s1606_s17 }
  0xbf   : > { %v717_v61 = vpop.permute.xlu0 %716 }
  0xc0   : > { %v721_v62 = vmul.f32 %v717_v61, %v1747_v56  ;;  %v719_v25 = vmul.f32 %v717_v61, %v1778_v14  ;;  %v720_v26 = vmul.f32 %v717_v61, %v1788_v19  ;;  %v722_v29 = vmul.f32 %v717_v61, %v1795_v22 }
  0xc1   : > { %557 = vrot.lane.b32.xlu1 %v546_v34, %s1606_s17 }
  0xc2   : > { %731 = vrot.lane.b32.xlu0 %v721_v62, %s1608_s19 }
  0xc5   : > { %580 = vrot.lane.b32.xlu1 %v572_v63, %s1607_s18 }
  0xc6   : > { %745 = vperm.xlu0 %1548, %v1661_v0  }
  0xc9   : > { %582 = vrot.lane.b32.xlu1 %v573_v13, %s1607_s18 }
  0xca   : > { %1549 = vset.pattern.permute.xlu0 %v1609_v3 }
  0xcd   : > { %586 = vrot.lane.b32.xlu1 %v575_v5, %s1607_s18 }
  0xd1   : > { %610 = vrot.lane.b32.xlu1 %v602_v6, %s1607_s18 }
  0xd5   : > { %612 = vrot.lane.b32.xlu1 %v603_v9, %s1607_s18 }
  0xd9   : > { %616 = vrot.lane.b32.xlu1 %v605_v10, %s1607_s18  ;;  %v1610_v10 = vmov 4  }
  0xdd   : > { %639 = vrot.lane.b32.xlu1 %v631_v8, %s1607_s18 }
  0xe1   : > { %641 = vrot.lane.b32.xlu1 %v632_v12, %s1607_s18 }
  0xe5   : > { %645 = vrot.lane.b32.xlu1 %v634_v16, %s1607_s18 }
  0xe9   : > { %668 = vrot.lane.b32.xlu1 %v660_v17, %s1607_s18 }
  0xed   : > { %670 = vrot.lane.b32.xlu1 %v661_v18, %s1607_s18 }
  0xf1   : > { %674 = vrot.lane.b32.xlu1 %v663_v20, %s1607_s18 }
  0xf5   : > { %697 = vrot.lane.b32.xlu1 %v689_v21, %s1608_s19 }
  0xf9   : > { %699 = vrot.lane.b32.xlu1 %v690_v23, %s1608_s19 }
  0xfd   : > { %703 = vrot.lane.b32.xlu1 %v692_v24, %s1608_s19 }
 0x101   : > { %727 = vrot.lane.b32.xlu1 %v719_v25, %s1608_s19 }
 0x105   : > { %729 = vrot.lane.b32.xlu1 %v720_v26, %s1608_s19 }
 0x107   : > { %v1887_v27 = vpop.permute.xlu0 %359  ;;  %v1889_v28 = vpop.permute.xlu1 %355 }
 0x109   : > { %733 = vrot.lane.b32.xlu1 %v722_v29, %s1608_s19 }
 0x10b   : > { %v1893_v30 = vpop.permute.xlu1 %357 }
 0x10c   : > { %v1895_v31 = vpop.permute.xlu0 %425 }
 0x10f   : > { %v362_v36 = vpop.permute.xlu1 %361 }
 0x111   : > { %v1897_v40 = vpop.permute.xlu0 %490 }
 0x113   : > { %v1899_v41 = vpop.permute.xlu1 %421 }
 0x116   : > { %v1901_v44 = vpop.permute.xlu0 %555 }
 0x117   : > { %v1903_v45 = vpop.permute.xlu1 %423 }
 0x11b   : > { %v1905_v46 = vpop.permute.xlu0 %584  ;;  %v428_v47 = vpop.permute.xlu1 %427 }
 0x11f   : > { %v1909_v50 = vpop.permute.xlu1 %486 }
 0x120   : > { %v1907_v49 = vpop.permute.xlu0 %614  ;;  %2367 = vst [vmem:[#allocation2_spill] sm:$0xff] %v1909_v50 }
 0x123   : > { %v1913_v4 = vpop.permute.xlu1 %488 }
 0x125   : > { %v1911_v11 = vpop.permute.xlu0 %643 }
 0x127   : > { %v493_v55 = vpop.permute.xlu1 %492 }
 0x12a   : > { %v1915_v53 = vpop.permute.xlu0 %672 }
 0x12b   : > { %v1919_v57 = vpop.permute.xlu1 %551 }
 0x12c   : > { %2368 = vst [vmem:[#allocation3_spill] sm:$0xff] %v1919_v57 }
 0x12f   : > { %v1917_v35 = vpop.permute.xlu0 %701  ;;  %v1923_v34 = vpop.permute.xlu1 %553 }
 0x133   : > { %v558_v3 = vpop.permute.xlu1 %557 }
 0x134   : > { %v1921_v61 = vpop.permute.xlu0 %731 }
 0x137   : > { %v1933_v9 = vpop.permute.xlu1 %580 }
 0x138   : > { %2369 = vst [vmem:[#allocation4_spill] sm:$0xff] %v1933_v9 }
 0x13b   : > { %v1936_v8 = vpop.permute.xlu1 %582 }
 0x13f   : > { %v587_v12 = vpop.permute.xlu1 %586 }
 0x141   : > { %v746_v62 = vpop.permute.xlu0 %745 }
 0x142   : > { %v750_v63 = vmul.f32 %v746_v62, %v1765_v2  ;;  %v748_v13 = vmul.f32 %v746_v62, %v1806_v7  ;;  %v749_v5 = vmul.f32 %v746_v62, %v1813_v39  ;;  %v751_v6 = vmul.f32 %v746_v62, %v1819_v42 }
 0x143   : > { %v1938_v16 = vpop.permute.xlu1 %610 }
 0x144   : > { %760 = vrot.lane.b32.xlu0 %v750_v63, %s1608_s19  ;;  %756 = vrot.lane.b32.xlu1 %v748_v13, %s1608_s19  ;;  %2370 = vst [vmem:[#allocation5_spill] sm:$0xff] %v1938_v16  ;;  %v561_v16 = vsel %vm363_vm0, %v1901_v44, %v558_v3 }
 0x147   : > { %v1940_v17 = vpop.permute.xlu1 %612 }
 0x148   : > { %774 = vperm.xlu0 %1549, %v1661_v0   ;;  %758 = vrot.lane.b32.xlu1 %v749_v5, %s1608_s19  ;;  %v366_v5 = vsel %vm363_vm0, %v1887_v27, %v362_v36 }
 0x14b   : > { %v617_v18 = vpop.permute.xlu1 %616 }
 0x14c   : > { %762 = vrot.lane.b32.xlu1 %v751_v6, %s1608_s19  ;;  %1550 = vset.pattern.permute.xlu0 %v1610_v10  ;;  %v431_v6 = vsel %vm363_vm0, %v1895_v31, %v428_v47  ;;  %v372_v10 = vadd.f32 %v366_v5, %v1756_v60  ;;  %v620_v47 = vsel %vm588_vm1, %v1907_v49, %v617_v18 }
 0x14f   : > { %v1942_v20 = vpop.permute.xlu1 %639 }
 0x150   : > { %2371 = vst [vmem:[#allocation6_spill] sm:$0xff] %v1942_v20  ;;  %v496_v20 = vsel %vm363_vm0, %v1897_v40, %v493_v55 }
 0x153   : > { %v1944_v21 = vpop.permute.xlu1 %641 }
 0x157   : > { %v646_v23 = vpop.permute.xlu1 %645 }
 0x158   : > { %v649_v5 = vsel %vm588_vm1, %v1911_v11, %v646_v23 }
 0x15b   : > { %v1946_v24 = vpop.permute.xlu1 %668 }
 0x15c   : > { %2372 = vst [vmem:[#allocation7_spill] sm:$0xff] %v1946_v24 }
 0x15f   : > { %v1948_v25 = vpop.permute.xlu1 %670 }
 0x163   : > { %v675_v26 = vpop.permute.xlu1 %674 }
 0x164   : > { %v678_v3 = vsel %vm588_vm1, %v1915_v53, %v675_v26 }
 0x167   : > { %v1950_v29 = vpop.permute.xlu1 %697 }
 0x168   : > { %2373 = vst [vmem:[#allocation8_spill] sm:$0xff] %v1950_v29  ;;  %v437_v29 = vadd.f32 %v431_v6, %v372_v10 }
 0x16a   : > { %v502_v9 = vadd.f32 %v496_v20, %v437_v29 }
 0x16b   : > { %v1952_v62 = vpop.permute.xlu1 %699 }
 0x16c   : > { %v567_v36 = vadd.f32 %v561_v16, %v502_v9 }
 0x16f   : > { %v704_v63 = vpop.permute.xlu1 %703 }
 0x173   : > { %v1954_v13 = vpop.permute.xlu1 %727 }
 0x174   : > { %2374 = vst [vmem:[#allocation9_spill] sm:$0xff] %v1954_v13  ;;  %v591_v13 = vsel %vm588_vm1, %v1905_v46, %v587_v12  ;;  %v708_v12 = vsel %vm705_vm2, %v1917_v35, %v704_v63 }
 0x175   : > { %v597_v60 = vadd.f32 %v591_v13, %v567_v36 }
 0x177   : > { %v1961_v24 = vpop.permute.xlu1 %729  ;;  %v626_v50 = vadd.f32 %v620_v47, %v597_v60  ;;  %v1611_v60 = vmov 13  }
 0x179   : > { %v655_v20 = vadd.f32 %v649_v5, %v626_v50  ;;  %v187_v5 = vmul.f32 %v1754_v59, %v1721_v37 }
 0x17b   : > { %v734_v57 = vpop.permute.xlu1 %733  ;;  %v684_v9 = vadd.f32 %v678_v3, %v655_v20  ;;  %v224_v3 = vmul.f32 %v1788_v19, %v1711_v33  ;;  %v190_v20 = vadd.f32 %v187_v5, %v1709_v32 }
 0x17c   : > { %v737_v18 = vsel %vm705_vm2, %v1921_v61, %v734_v57 }
 0x17d   : > { %v714_v29 = vadd.f32 %v708_v12, %v684_v9  ;;  %v227_v12 = vadd.f32 %v224_v3, %v190_v20  ;;  %v261_v9 = vmul.f32 %v1813_v39, %v1723_v38 }
 0x17f   : > { %v743_v13 = vadd.f32 %v737_v18, %v714_v29  ;;  %v264_v18 = vadd.f32 %v261_v9, %v227_v12  ;;  %v298_v29 = vmul.f32 %v1838_v54, %v1741_v51 }
 0x1b6   : > { %v1973_v55 = vpop.permute.xlu1 %756  ;;  %v761_v23 = vpop.permute.xlu0 %760 }
 0x1ba   : > { %v1979_v16 = vpop.permute.xlu1 %758 }
 0x1be   : > { %v763_v6 = vpop.permute.xlu1 %762 }
 0x1bf   : > { %v766_v10 = vsel %vm705_vm2, %v761_v23, %v763_v6  ;;  %v301_v6 = vadd.f32 %v298_v29, %v264_v18 }
 0x1c0   : > { %v772_v36 = vadd.f32 %v766_v10, %v743_v13  ;;  %v365_v13 = vsel %vm363_vm0, %v1893_v30, %v1887_v27  ;;  %v430_v10 = vsel %vm363_vm0, %v1903_v45, %v1895_v31  ;;  %v590_v27 = vsel %vm588_vm1, %v1936_v8, %v1905_v46 }
 0x1c1   : > { %v619_v31 = vsel %vm588_vm1, %v1940_v17, %v1907_v49  ;;  %v707_v46 = vsel %vm705_vm2, %v1952_v62, %v1917_v35  ;;  %v736_v49 = vsel %vm705_vm2, %v1961_v24, %v1921_v61 }
 0x1c3   : > { %v775_v47 = vpop.permute.xlu0 %774 }
 0x1c4   : > { %v779_v50 = vmul.f32 %v775_v47, %v1782_v15  ;;  %v777_v26 = vmul.f32 %v775_v47, %v1830_v52  ;;  %v778_v63 = vmul.f32 %v775_v47, %v1838_v54  ;;  %v780_v57 = vmul.f32 %v775_v47, %v1844_v58 }
 0x1c5   : > { %v371_v47 = vadd.f32 %v365_v13, %v301_v6 }
 0x1c6   : > { %789 = vrot.lane.b32.xlu0 %v779_v50, %s1608_s19  ;;  %785 = vrot.lane.b32.xlu1 %v777_v26, %s1608_s19  ;;  %v495_v50 = vsel %vm363_vm0, %v1913_v4, %v1897_v40  ;;  %v648_v40 = vsel %vm588_vm1, %v1944_v21, %v1911_v11  ;;  %v765_v11 = vsel %vm705_vm2, %v1979_v16, %v761_v23 }
 0x1c7   : > { %v436_v26 = vadd.f32 %v430_v10, %v371_v47 }
 0x1ca   : > { %803 = vperm.xlu0 %1550, %v1661_v0   ;;  %787 = vrot.lane.b32.xlu1 %v778_v63, %s1608_s19  ;;  %v560_v63 = vsel %vm363_vm0, %v1923_v34, %v1901_v44  ;;  %v677_v44 = vsel %vm588_vm1, %v1948_v25, %v1915_v53 }
 0x1ce   : > { %791 = vrot.lane.b32.xlu1 %v780_v57, %s1608_s19  ;;  %1551 = vset.pattern.permute.xlu0 %v1611_v60  ;;  %v501_v57 = vadd.f32 %v495_v50, %v436_v26 }
 0x1d0   : > { %v566_v60 = vadd.f32 %v560_v63, %v501_v57 }
 0x1d2   : > { %v596_v5 = vadd.f32 %v590_v27, %v566_v60 }
 0x1d4   : > { %v625_v3 = vadd.f32 %v619_v31, %v596_v5 }
 0x1d6   : > { %v654_v20 = vadd.f32 %v648_v40, %v625_v3 }
 0x1d8   : > { %v683_v12 = vadd.f32 %v677_v44, %v654_v20 }
 0x1da   : > { %v713_v9 = vadd.f32 %v707_v46, %v683_v12 }
 0x1dc   : > { %v742_v29 = vadd.f32 %v736_v49, %v713_v9 }
 0x1de   : > { %v771_v13 = vadd.f32 %v765_v11, %v742_v29 }
 0x238   : > { %v2032_v18 = vpop.permute.xlu1 %785  ;;  %v790_v6 = vpop.permute.xlu0 %789 }
 0x23c   : > { %v2036_v53 = vpop.permute.xlu1 %787 }
 0x23d   : > { %v794_v10 = vsel %vm705_vm2, %v2036_v53, %v790_v6 }
 0x23e   : > { %v800_v35 = vadd.f32 %v794_v10, %v771_v13  ;;  %v1614_v13 = vmov 31  }
 0x240   : > { %v792_v47 = vpop.permute.xlu1 %791 }
 0x241   : > { %v795_v50 = vsel %vm705_vm2, %v790_v6, %v792_v47 }
 0x242   : > { %v801_v26 = vadd.f32 %v795_v50, %v772_v36  ;;  %v1613_v36 = vmov 22  }
 0x245   : > { %v804_v61 = vpop.permute.xlu0 %803 }
 0x246   : > { %v808_v63 = vmul.f32 %v804_v61, %v1731_v43  ;;  %v806_v57 = vmul.f32 %v804_v61, %v1739_v48  ;;  %v807_v23 = vmul.f32 %v804_v61, %v1754_v59  ;;  %v809_v27 = vmul.f32 %v804_v61, %v1762_v1 }
 0x248   : > { %818 = vrot.lane.b32.xlu0 %v808_v63, %s1612_s20  ;;  %814 = vrot.lane.b32.xlu1 %v806_v57, %s1612_s20 }
 0x24c   : > { %833 = vperm.xlu0 %1551, %v1661_v0   ;;  %816 = vrot.lane.b32.xlu1 %v807_v23, %s1612_s20 }
 0x250   : > { %820 = vrot.lane.b32.xlu1 %v809_v27, %s1612_s20  ;;  %1552 = vset.pattern.permute.xlu0 %v1613_v36 }
 0x2ba   : > { %v2050_v60 = vpop.permute.xlu1 %814  ;;  %v819_v31 = vpop.permute.xlu0 %818 }
 0x2be   : > { %v2052_v5 = vpop.permute.xlu1 %816 }
 0x2bf   : > { %v824_v40 = vsel %vm822_vm3, %v2052_v5, %v819_v31 }
 0x2c0   : > { %v830_v3 = vadd.f32 %v824_v40, %v800_v35  ;;  %v1615_v40 = vmov 5  }
 0x2c2   : > { %v821_v44 = vpop.permute.xlu1 %820 }
 0x2c3   : > { %v825_v20 = vsel %vm822_vm3, %v819_v31, %v821_v44 }
 0x2c4   : > { %v831_v46 = vadd.f32 %v825_v20, %v801_v26 }
 0x2c7   : > { %v834_v12 = vpop.permute.xlu0 %833 }
 0x2c8   : > { %v838_v49 = vmul.f32 %v834_v12, %v1747_v56  ;;  %v836_v9 = vmul.f32 %v834_v12, %v1778_v14  ;;  %v837_v11 = vmul.f32 %v834_v12, %v1788_v19  ;;  %v839_v29 = vmul.f32 %v834_v12, %v1795_v22 }
 0x2ca   : > { %848 = vrot.lane.b32.xlu0 %v838_v49, %s1612_s20  ;;  %844 = vrot.lane.b32.xlu1 %v836_v9, %s1612_s20 }
 0x2ce   : > { %862 = vperm.xlu0 %1552, %v1661_v0   ;;  %846 = vrot.lane.b32.xlu1 %v837_v11, %s1612_s20 }
 0x2d2   : > { %850 = vrot.lane.b32.xlu1 %v839_v29, %s1612_s20  ;;  %1553 = vset.pattern.permute.xlu0 %v1614_v13 }
 0x33c   : > { %v2066_v6 = vpop.permute.xlu1 %844  ;;  %v849_v10 = vpop.permute.xlu0 %848 }
 0x340   : > { %v2068_v35 = vpop.permute.xlu1 %846 }
 0x341   : > { %v853_v47 = vsel %vm822_vm3, %v2068_v35, %v849_v10 }
 0x342   : > { %v859_v50 = vadd.f32 %v853_v47, %v830_v3  ;;  %v1616_v3 = vmov 14  }
 0x343   : > { %1555 = vset.pattern.permute.xlu1 %v1616_v3  ;;  %v1624_v3 = vmov 35  }
 0x344   : > { %v851_v26 = vpop.permute.xlu1 %850 }
 0x345   : > { %v854_v61 = vsel %vm822_vm3, %v849_v10, %v851_v26 }
 0x346   : > { %v860_v63 = vadd.f32 %v854_v61, %v831_v46 }
 0x349   : > { %v863_v57 = vpop.permute.xlu0 %862 }
 0x34a   : > { %v867_v23 = vmul.f32 %v863_v57, %v1765_v2  ;;  %v865_v27 = vmul.f32 %v863_v57, %v1806_v7  ;;  %v866_v36 = vmul.f32 %v863_v57, %v1813_v39  ;;  %v868_v31 = vmul.f32 %v863_v57, %v1819_v42 }
 0x34b   : > { %v1618_v57 = vmov 24  }
 0x34c   : > { %877 = vrot.lane.b32.xlu0 %v867_v23, %s1612_s20  ;;  %873 = vrot.lane.b32.xlu1 %v865_v27, %s1612_s20  ;;  %v1619_v23 = vmov 23   ;;  %v1620_v27 = vmov 16  }
 0x350   : > { %891 = vperm.xlu0 %1553, %v1661_v0   ;;  %875 = vrot.lane.b32.xlu1 %v866_v36, %s1612_s20  ;;  %v1621_v36 = vmov 6  }
 0x354   : > { %879 = vrot.lane.b32.xlu1 %v868_v31, %s1612_s20  ;;  %1554 = vset.pattern.permute.xlu0 %v1615_v40  ;;  %v1622_v31 = vmov 8   ;;  %v1623_v40 = vmov 15  }
 0x3be   : > { %v874_v44 = vpop.permute.xlu1 %873  ;;  %v878_v20 = vpop.permute.xlu0 %877 }
 0x3c2   : > { %v876_v46 = vpop.permute.xlu1 %875 }
 0x3c3   : > { %v2083_v12 = vsel %vm822_vm3, %v874_v44, %v876_v46  ;;  %v882_v49 = vsel %vm822_vm3, %v876_v46, %v878_v20  ;;  %v1625_v44 = vmov 33   ;;  %v1627_v46 = vmov 25  }
 0x3c4   : > { %v2086_v9 = vadd.f32 %v882_v49, %v859_v50  ;;  %v1628_v49 = vmov 34  }
 0x3c6   : > { %v880_v11 = vpop.permute.xlu1 %879 }
 0x3c7   : > { %v883_v29 = vsel %vm822_vm3, %v878_v20, %v880_v11  ;;  %v1626_v20 = vmov 7   ;;  %v1629_v11 = vmov 17  }
 0x3c8   : > { %v2089_v13 = vadd.f32 %v883_v29, %v860_v63  ;;  %v1617_v63 = vmov 32   ;;  %v1630_v29 = vmov 26  }
 0x3cb   : > { %v892_v10 = vpop.permute.xlu0 %891 }
 0x3cc   : > { %v896_v47 = vmul.f32 %v892_v10, %v1782_v15  ;;  %v894_v26 = vmul.f32 %v892_v10, %v1830_v52  ;;  %v895_v61 = vmul.f32 %v892_v10, %v1838_v54  ;;  %v897_v50 = vmul.f32 %v892_v10, %v1844_v58 }
 0x3cd   : > { %v186_v10 = vmul.f32 %v1739_v48, %v1721_v37  ;;  %v429_v37 = vsel %vm363_vm0, %v1899_v41, %v1903_v45 }
 0x3ce   : > { %906 = vrot.lane.b32.xlu0 %v896_v47, %s1612_s20  ;;  %902 = vrot.lane.b32.xlu1 %v894_v26, %s1612_s20  ;;  %v223_v47 = vmul.f32 %v1778_v14, %v1711_v33 }
 0x3cf   : > { %v189_v26 = vadd.f32 %v186_v10, %v1709_v32  ;;  %v2375_v32 = vld [vmem:[#allocation2_spill] sm:$0xff]  ;;  %v2382_v10 = vld [vmem:[#allocation9_spill] sm:$0xff] }
 0x3d2   : > { %920 = vperm.xlu0 %1554, %v1661_v0   ;;  %904 = vrot.lane.b32.xlu1 %v895_v61, %s1612_s20  ;;  %v226_v61 = vadd.f32 %v223_v47, %v189_v26 }
 0x3d6   : > { %908 = vrot.lane.b32.xlu1 %v897_v50, %s1612_s20  ;;  %1557 = vset.pattern.permute.xlu0 %v1617_v63  ;;  %v260_v50 = vmul.f32 %v1806_v7, %v1723_v38  ;;  %v2376_v38 = vld [vmem:[#allocation3_spill] sm:$0xff] }
 0x3d7   : > { %1008 = vperm.xlu0 %1557, %v1661_v0  }
 0x3d8   : > { %v263_v63 = vadd.f32 %v260_v50, %v226_v61 }
 0x3da   : > { %950 = vperm.xlu1 %1555, %v1661_v0  }
 0x3db   : > { %1560 = vset.pattern.permute.xlu0 %v1618_v57  ;;  %v297_v57 = vmul.f32 %v1830_v52, %v1741_v51 }
 0x3dc   : > { %1096 = vperm.xlu0 %1560, %v1661_v0  }
 0x3de   : > { %1556 = vset.pattern.permute.xlu1 %v1619_v23  ;;  %v300_v23 = vadd.f32 %v297_v57, %v263_v63 }
 0x3df   : > { %979 = vperm.xlu1 %1556, %v1661_v0  }
 0x3e0   : > { %1563 = vset.pattern.permute.xlu0 %v1620_v27  ;;  %v494_v27 = vsel %vm363_vm0, %v2375_v32, %v1913_v4 }
 0x3e1   : > { %1184 = vperm.xlu0 %1563, %v1661_v0  }
 0x3e3   : > { %1558 = vset.pattern.permute.xlu1 %v1621_v36 }
 0x3e4   : > { %1037 = vperm.xlu1 %1558, %v1661_v0  }
 0x3e5   : > { %1566 = vset.pattern.permute.xlu0 %v1622_v31  ;;  %v559_v31 = vsel %vm363_vm0, %v2376_v38, %v1923_v34 }
 0x3e6   : > { %1271 = vperm.xlu0 %1566, %v1661_v0  }
 0x3e8   : > { %1559 = vset.pattern.permute.xlu1 %v1623_v40  ;;  %v2377_v40 = vld [vmem:[#allocation4_spill] sm:$0xff] }
 0x3e9   : > { %1067 = vperm.xlu1 %1559, %v1661_v0  }
 0x3ea   : > { %1569 = vset.pattern.permute.xlu0 %v1624_v3  ;;  %v2378_v3 = vld [vmem:[#allocation5_spill] sm:$0xff] }
 0x3eb   : > { %1359 = vperm.xlu0 %1569, %v1661_v0   ;;  %v618_v41 = vsel %vm588_vm1, %v2378_v3, %v1940_v17  ;;  %v735_v17 = vsel %vm705_vm2, %v2382_v10, %v1961_v24  ;;  %v852_v24 = vsel %vm822_vm3, %v2066_v6, %v2068_v35 }
 0x3ed   : > { %1561 = vset.pattern.permute.xlu1 %v1625_v44  ;;  %v2379_v44 = vld [vmem:[#allocation6_spill] sm:$0xff] }
 0x3ee   : > { %1125 = vperm.xlu1 %1561, %v1661_v0   ;;  %v647_v4 = vsel %vm588_vm1, %v2379_v44, %v1944_v21  ;;  %v764_v21 = vsel %vm705_vm2, %v1973_v55, %v1979_v16 }
 0x3f2   : > { %1562 = vset.pattern.permute.xlu1 %v1626_v20 }
 0x3f3   : > { %1154 = vperm.xlu1 %1562, %v1661_v0  }
 0x3f7   : > { %1564 = vset.pattern.permute.xlu1 %v1627_v46  ;;  %v2380_v46 = vld [vmem:[#allocation7_spill] sm:$0xff] }
 0x3f8   : > { %1213 = vperm.xlu1 %1564, %v1661_v0   ;;  %v676_v34 = vsel %vm588_vm1, %v2380_v46, %v1948_v25  ;;  %v793_v25 = vsel %vm705_vm2, %v2032_v18, %v2036_v53 }
 0x3fc   : > { %1565 = vset.pattern.permute.xlu1 %v1628_v49 }
 0x3fd   : > { %1242 = vperm.xlu1 %1565, %v1661_v0  }
 0x401   : > { %1567 = vset.pattern.permute.xlu1 %v1629_v11  ;;  %v2381_v11 = vld [vmem:[#allocation8_spill] sm:$0xff] }
 0x402   : > { %1301 = vperm.xlu1 %1567, %v1661_v0  }
 0x406   : > { %1568 = vset.pattern.permute.xlu1 %v1630_v29 }
 0x407   : > { %1330 = vperm.xlu1 %1568, %v1661_v0   ;;  %v364_v0 = vsel %vm363_vm0, %v1889_v28, %v1893_v30  ;;  %v589_v28 = vsel %vm588_vm1, %v2377_v40, %v1936_v8  ;;  %v706_v8 = vsel %vm705_vm2, %v2381_v11, %v1952_v62  ;;  %v823_v62 = vsel %vm822_vm3, %v2050_v60, %v2052_v5 }
 0x408   : > { %v370_v33 = vadd.f32 %v364_v0, %v300_v23 }
 0x40a   : > { %v435_v36 = vadd.f32 %v429_v37, %v370_v33 }
 0x40c   : > { %v500_v51 = vadd.f32 %v494_v27, %v435_v36 }
 0x40e   : > { %v565_v30 = vadd.f32 %v559_v31, %v500_v51 }
 0x410   : > { %v595_v45 = vadd.f32 %v589_v28, %v565_v30 }
 0x412   : > { %v624_v20 = vadd.f32 %v618_v41, %v595_v45 }
 0x414   : > { %v653_v49 = vadd.f32 %v647_v4, %v624_v20 }
 0x416   : > { %v682_v29 = vadd.f32 %v676_v34, %v653_v49 }
 0x418   : > { %v712_v47 = vadd.f32 %v706_v8, %v682_v29 }
 0x41a   : > { %v741_v26 = vadd.f32 %v735_v17, %v712_v47 }
 0x41c   : > { %v770_v61 = vadd.f32 %v764_v21, %v741_v26 }
 0x41e   : > { %v799_v50 = vadd.f32 %v793_v25, %v770_v61 }
 0x420   : > { %v829_v63 = vadd.f32 %v823_v62, %v799_v50 }
 0x422   : > { %v858_v0 = vadd.f32 %v852_v24, %v829_v63 }
 0x424   : > { %v887_v55 = vadd.f32 %v2083_v12, %v858_v0 }
 0x440   : > { %v903_v57 = vpop.permute.xlu1 %902  ;;  %v907_v16 = vpop.permute.xlu0 %906 }
 0x444   : > { %v905_v23 = vpop.permute.xlu1 %904 }
 0x445   : > { %v910_v37 = vsel %vm822_vm3, %v903_v57, %v905_v23  ;;  %v911_v18 = vsel %vm822_vm3, %v905_v23, %v907_v16 }
 0x446   : > { %v2169_v53 = vadd.f32 %v910_v37, %v887_v55  ;;  %v2172_v60 = vadd.f32 %v911_v18, %v2086_v9 }
 0x448   : > { %v909_v5 = vpop.permute.xlu1 %908 }
 0x449   : > { %v912_v33 = vsel %vm822_vm3, %v907_v16, %v909_v5 }
 0x44a   : > { %v2176_v6 = vadd.f32 %v912_v33, %v2089_v13 }
 0x44d   : > { %v921_v35 = vpop.permute.xlu0 %920 }
 0x44e   : > { %v923_v12 = vmul.f32 %v921_v35, %v1739_v48  ;;  %v925_v32 = vmul.f32 %v921_v35, %v1731_v43  ;;  %v924_v27 = vmul.f32 %v921_v35, %v1754_v59  ;;  %v926_v36 = vmul.f32 %v921_v35, %v1762_v1 }
 0x450   : > { %935 = vrot.lane.b32.xlu0 %v925_v32, %s1631_s21  ;;  %931 = vrot.lane.b32.xlu1 %v923_v12, %s1631_s21 }
 0x452   : > { %v1009_v30 = vpop.permute.xlu0 %1008 }
 0x453   : > { %v1011_v45 = vmul.f32 %v1009_v30, %v1830_v52  ;;  %v1012_v20 = vmul.f32 %v1009_v30, %v1838_v54  ;;  %v1013_v46 = vmul.f32 %v1009_v30, %v1782_v15  ;;  %v1014_v49 = vmul.f32 %v1009_v30, %v1844_v58 }
 0x454   : > { %933 = vrot.lane.b32.xlu1 %v924_v27, %s1631_s21 }
 0x455   : > { %v951_v9 = vpop.permute.xlu1 %950 }
 0x456   : > { %v953_v13 = vmul.f32 %v951_v9, %v1778_v14  ;;  %v954_v38 = vmul.f32 %v951_v9, %v1788_v19  ;;  %v955_v31 = vmul.f32 %v951_v9, %v1747_v56  ;;  %v956_v28 = vmul.f32 %v951_v9, %v1795_v22 }
 0x457   : > { %v1097_v47 = vpop.permute.xlu0 %1096 }
 0x458   : > { %937 = vrot.lane.b32.xlu1 %v926_v36, %s1631_s21  ;;  %961 = vrot.lane.b32.xlu0 %v953_v13, %s1631_s21  ;;  %v1099_v25 = vmul.f32 %v1097_v47, %v1806_v7  ;;  %v1100_v50 = vmul.f32 %v1097_v47, %v1813_v39  ;;  %v1101_v24 = vmul.f32 %v1097_v47, %v1765_v2 }
 0x459   : > { %v1102_v57 = vmul.f32 %v1097_v47, %v1819_v42 }
 0x45a   : > { %v980_v51 = vpop.permute.xlu1 %979 }
 0x45b   : > { %v982_v40 = vmul.f32 %v980_v51, %v1806_v7  ;;  %v983_v3 = vmul.f32 %v980_v51, %v1813_v39  ;;  %v984_v41 = vmul.f32 %v980_v51, %v1765_v2  ;;  %v985_v44 = vmul.f32 %v980_v51, %v1819_v42 }
 0x45c   : > { %963 = vrot.lane.b32.xlu1 %v954_v38, %s1631_s21  ;;  %965 = vrot.lane.b32.xlu0 %v955_v31, %s1631_s21  ;;  %v1185_v18 = vpop.permute.xlu0 %1184 }
 0x45d   : > { %v1187_v35 = vmul.f32 %v1185_v18, %v1778_v14  ;;  %v1188_v27 = vmul.f32 %v1185_v18, %v1788_v19  ;;  %v1189_v9 = vmul.f32 %v1185_v18, %v1747_v56  ;;  %v1190_v13 = vmul.f32 %v1185_v18, %v1795_v22 }
 0x45f   : > { %v1038_v4 = vpop.permute.xlu1 %1037 }
 0x460   : > { %967 = vrot.lane.b32.xlu1 %v956_v28, %s1631_s21  ;;  %990 = vrot.lane.b32.xlu0 %v982_v40, %s1631_s21  ;;  %v1040_v34 = vmul.f32 %v1038_v4, %v1739_v48  ;;  %v1041_v8 = vmul.f32 %v1038_v4, %v1754_v59  ;;  %v1042_v29 = vmul.f32 %v1038_v4, %v1731_v43 }
 0x461   : > { %v1043_v17 = vmul.f32 %v1038_v4, %v1762_v1  ;;  %v1272_v30 = vpop.permute.xlu0 %1271 }
 0x464   : > { %992 = vrot.lane.b32.xlu1 %v983_v3, %s1631_s21  ;;  %994 = vrot.lane.b32.xlu0 %v984_v41, %s1631_s21  ;;  %v1068_v11 = vpop.permute.xlu1 %1067 }
 0x465   : > { %v1070_v10 = vmul.f32 %v1068_v11, %v1778_v14  ;;  %v1071_v21 = vmul.f32 %v1068_v11, %v1788_v19  ;;  %v1072_v26 = vmul.f32 %v1068_v11, %v1747_v56  ;;  %v1073_v61 = vmul.f32 %v1068_v11, %v1795_v22 }
 0x468   : > { %996 = vrot.lane.b32.xlu1 %v985_v44, %s1631_s21  ;;  %1019 = vrot.lane.b32.xlu0 %v1011_v45, %s1631_s21  ;;  %v1274_v45 = vmul.f32 %v1272_v30, %v1739_v48 }
 0x469   : > { %v1126_v62 = vpop.permute.xlu1 %1125 }
 0x46a   : > { %v1128_v63 = vmul.f32 %v1126_v62, %v1830_v52  ;;  %v1129_v55 = vmul.f32 %v1126_v62, %v1838_v54  ;;  %v1130_v16 = vmul.f32 %v1126_v62, %v1782_v15  ;;  %v1131_v37 = vmul.f32 %v1126_v62, %v1844_v58 }
 0x46c   : > { %1021 = vrot.lane.b32.xlu1 %v1012_v20, %s1631_s21  ;;  %1023 = vrot.lane.b32.xlu0 %v1013_v46, %s1631_s21  ;;  %v1275_v20 = vmul.f32 %v1272_v30, %v1754_v59  ;;  %v1276_v46 = vmul.f32 %v1272_v30, %v1731_v43 }
 0x46e   : > { %v1155_v0 = vpop.permute.xlu1 %1154 }
 0x46f   : > { %v1157_v23 = vmul.f32 %v1155_v0, %v1739_v48  ;;  %v1158_v5 = vmul.f32 %v1155_v0, %v1754_v59  ;;  %v1159_v33 = vmul.f32 %v1155_v0, %v1731_v43  ;;  %v1160_v12 = vmul.f32 %v1155_v0, %v1762_v1 }
 0x470   : > { %1025 = vrot.lane.b32.xlu1 %v1014_v49, %s1631_s21  ;;  %1048 = vrot.lane.b32.xlu0 %v1040_v34, %s1632_s22  ;;  %v1277_v48 = vmul.f32 %v1272_v30, %v1762_v1 }
 0x473   : > { %v1214_v32 = vpop.permute.xlu1 %1213 }
 0x474   : > { %1050 = vrot.lane.b32.xlu1 %v1041_v8, %s1632_s22  ;;  %1052 = vrot.lane.b32.xlu0 %v1042_v29, %s1632_s22  ;;  %v1216_v36 = vmul.f32 %v1214_v32, %v1806_v7  ;;  %v1217_v31 = vmul.f32 %v1214_v32, %v1813_v39  ;;  %v1218_v51 = vmul.f32 %v1214_v32, %v1765_v2 }
 0x475   : > { %v1219_v28 = vmul.f32 %v1214_v32, %v1819_v42 }
 0x478   : > { %1054 = vrot.lane.b32.xlu1 %v1043_v17, %s1632_s22  ;;  %1078 = vrot.lane.b32.xlu0 %v1070_v10, %s1632_s22  ;;  %v1243_v38 = vpop.permute.xlu1 %1242 }
 0x479   : > { %v1245_v40 = vmul.f32 %v1243_v38, %v1830_v52  ;;  %v1246_v3 = vmul.f32 %v1243_v38, %v1838_v54  ;;  %v1247_v41 = vmul.f32 %v1243_v38, %v1782_v15  ;;  %v1248_v44 = vmul.f32 %v1243_v38, %v1844_v58 }
 0x47c   : > { %1080 = vrot.lane.b32.xlu1 %v1071_v21, %s1632_s22  ;;  %1082 = vrot.lane.b32.xlu0 %v1072_v26, %s1632_s22 }
 0x47d   : > { %v1302_v4 = vpop.permute.xlu1 %1301 }
 0x47e   : > { %v1304_v34 = vmul.f32 %v1302_v4, %v1778_v14  ;;  %v1305_v11 = vmul.f32 %v1302_v4, %v1788_v19  ;;  %v1306_v8 = vmul.f32 %v1302_v4, %v1747_v56  ;;  %v1307_v59 = vmul.f32 %v1302_v4, %v1795_v22  ;;  %v1360_v14 = vpop.permute.xlu0 %1359 }
 0x47f   : > { %v1362_v56 = vmul.f32 %v1360_v14, %v1830_v52  ;;  %v1363_v52 = vmul.f32 %v1360_v14, %v1838_v54  ;;  %v1364_v21 = vmul.f32 %v1360_v14, %v1782_v15 }
 0x480   : > { %1084 = vrot.lane.b32.xlu1 %v1073_v61, %s1632_s22  ;;  %1107 = vrot.lane.b32.xlu0 %v1099_v25, %s1632_s22 }
 0x482   : > { %v1331_v49 = vpop.permute.xlu1 %1330 }
 0x483   : > { %v1333_v43 = vmul.f32 %v1331_v49, %v1806_v7  ;;  %v1334_v1 = vmul.f32 %v1331_v49, %v1813_v39  ;;  %v1335_v29 = vmul.f32 %v1331_v49, %v1765_v2  ;;  %v1336_v7 = vmul.f32 %v1331_v49, %v1819_v42 }
 0x484   : > { %1109 = vrot.lane.b32.xlu1 %v1100_v50, %s1632_s22  ;;  %1111 = vrot.lane.b32.xlu0 %v1101_v24, %s1632_s22 }
 0x488   : > { %1113 = vrot.lane.b32.xlu1 %v1102_v57, %s1632_s22  ;;  %1136 = vrot.lane.b32.xlu0 %v1128_v63, %s1632_s22 }
 0x48c   : > { %1138 = vrot.lane.b32.xlu1 %v1129_v55, %s1632_s22  ;;  %1140 = vrot.lane.b32.xlu0 %v1130_v16, %s1632_s22 }
 0x490   : > { %1142 = vrot.lane.b32.xlu1 %v1131_v37, %s1632_s22  ;;  %1165 = vrot.lane.b32.xlu0 %v1157_v23, %s1633_s23 }
 0x494   : > { %1167 = vrot.lane.b32.xlu1 %v1158_v5, %s1633_s23  ;;  %1169 = vrot.lane.b32.xlu0 %v1159_v33, %s1633_s23 }
 0x498   : > { %1171 = vrot.lane.b32.xlu1 %v1160_v12, %s1633_s23  ;;  %1195 = vrot.lane.b32.xlu0 %v1187_v35, %s1633_s23 }
 0x49c   : > { %1197 = vrot.lane.b32.xlu1 %v1188_v27, %s1633_s23  ;;  %1199 = vrot.lane.b32.xlu0 %v1189_v9, %s1633_s23 }
 0x4a0   : > { %1201 = vrot.lane.b32.xlu1 %v1190_v13, %s1633_s23  ;;  %1224 = vrot.lane.b32.xlu0 %v1216_v36, %s1633_s23 }
 0x4a4   : > { %1226 = vrot.lane.b32.xlu1 %v1217_v31, %s1633_s23  ;;  %1228 = vrot.lane.b32.xlu0 %v1218_v51, %s1633_s23 }
 0x4a8   : > { %1230 = vrot.lane.b32.xlu1 %v1219_v28, %s1633_s23  ;;  %1253 = vrot.lane.b32.xlu0 %v1245_v40, %s1633_s23 }
 0x4ac   : > { %1255 = vrot.lane.b32.xlu1 %v1246_v3, %s1633_s23  ;;  %1257 = vrot.lane.b32.xlu0 %v1247_v41, %s1633_s23 }
 0x4b0   : > { %1259 = vrot.lane.b32.xlu1 %v1248_v44, %s1633_s23  ;;  %1282 = vrot.lane.b32.xlu0 %v1274_v45, %s1634_s24 }
 0x4b4   : > { %1284 = vrot.lane.b32.xlu1 %v1275_v20, %s1634_s24  ;;  %1286 = vrot.lane.b32.xlu0 %v1276_v46, %s1634_s24 }
 0x4b8   : > { %1288 = vrot.lane.b32.xlu1 %v1277_v48, %s1634_s24  ;;  %1312 = vrot.lane.b32.xlu0 %v1304_v34, %s1634_s24 }
 0x4bc   : > { %1314 = vrot.lane.b32.xlu1 %v1305_v11, %s1634_s24  ;;  %1316 = vrot.lane.b32.xlu0 %v1306_v8, %s1634_s24 }
 0x4c0   : > { %1318 = vrot.lane.b32.xlu1 %v1307_v59, %s1634_s24  ;;  %1341 = vrot.lane.b32.xlu0 %v1333_v43, %s1634_s24 }
 0x4c2   : > { %v932_v19 = vpop.permute.xlu1 %931  ;;  %v936_v22 = vpop.permute.xlu0 %935 }
 0x4c4   : > { %1343 = vrot.lane.b32.xlu1 %v1334_v1, %s1634_s24  ;;  %1345 = vrot.lane.b32.xlu0 %v1335_v29, %s1634_s24 }
 0x4c6   : > { %v934_v10 = vpop.permute.xlu1 %933 }
 0x4c7   : > { %v940_v17 = vsel %vm939_vm4, %v932_v19, %v934_v10  ;;  %v941_v47 = vsel %vm939_vm4, %v934_v10, %v936_v22 }
 0x4c8   : > { %v946_v39 = vadd.f32 %v940_v17, %v2169_v53  ;;  %v947_v2 = vadd.f32 %v941_v47, %v2172_v60  ;;  %1347 = vrot.lane.b32.xlu1 %v1336_v7, %s1634_s24  ;;  %1370 = vrot.lane.b32.xlu0 %v1362_v56, %s1634_s24  ;;  %v1365_v53 = vmul.f32 %v1360_v14, %v1844_v58 }
 0x4ca   : > { %v962_v26 = vpop.permute.xlu0 %961  ;;  %v938_v42 = vpop.permute.xlu1 %937 }
 0x4cb   : > { %v942_v25 = vsel %vm939_vm4, %v936_v22, %v938_v42 }
 0x4cc   : > { %v948_v61 = vadd.f32 %v942_v25, %v2176_v6  ;;  %1372 = vrot.lane.b32.xlu1 %v1363_v52, %s1634_s24  ;;  %1374 = vrot.lane.b32.xlu0 %v1364_v21, %s1634_s24 }
 0x4ce   : > { %v966_v60 = vpop.permute.xlu0 %965  ;;  %v964_v62 = vpop.permute.xlu1 %963 }
 0x4cf   : > { %v969_v50 = vsel %vm939_vm4, %v962_v26, %v964_v62  ;;  %v970_v54 = vsel %vm939_vm4, %v964_v62, %v966_v60 }
 0x4d0   : > { %v975_v24 = vadd.f32 %v969_v50, %v946_v39  ;;  %v976_v15 = vadd.f32 %v970_v54, %v947_v2  ;;  %1376 = vrot.lane.b32.xlu1 %v1365_v53, %s1634_s24 }
 0x4d2   : > { %v991_v63 = vpop.permute.xlu0 %990  ;;  %v968_v57 = vpop.permute.xlu1 %967 }
 0x4d3   : > { %v971_v6 = vsel %vm939_vm4, %v966_v60, %v968_v57 }
 0x4d4   : > { %v977_v0 = vadd.f32 %v971_v6, %v948_v61 }
 0x4d6   : > { %v995_v55 = vpop.permute.xlu0 %994  ;;  %v993_v16 = vpop.permute.xlu1 %992 }
 0x4d7   : > { %v998_v23 = vsel %vm939_vm4, %v991_v63, %v993_v16  ;;  %v999_v58 = vsel %vm939_vm4, %v993_v16, %v995_v55 }
 0x4d8   : > { %v1004_v37 = vadd.f32 %v998_v23, %v975_v24  ;;  %v1005_v18 = vadd.f32 %v999_v58, %v976_v15 }
 0x4da   : > { %v1020_v5 = vpop.permute.xlu0 %1019  ;;  %v997_v33 = vpop.permute.xlu1 %996 }
 0x4db   : > { %v1000_v35 = vsel %vm939_vm4, %v995_v55, %v997_v33 }
 0x4dc   : > { %v1006_v12 = vadd.f32 %v1000_v35, %v977_v0 }
 0x4de   : > { %v1024_v32 = vpop.permute.xlu0 %1023  ;;  %v1022_v27 = vpop.permute.xlu1 %1021 }
 0x4df   : > { %v1027_v9 = vsel %vm939_vm4, %v1020_v5, %v1022_v27  ;;  %v1028_v36 = vsel %vm939_vm4, %v1022_v27, %v1024_v32 }
 0x4e0   : > { %v1033_v13 = vadd.f32 %v1027_v9, %v1004_v37  ;;  %v1034_v38 = vadd.f32 %v1028_v36, %v1005_v18 }
 0x4e2   : > { %v1049_v31 = vpop.permute.xlu0 %1048  ;;  %v1026_v51 = vpop.permute.xlu1 %1025 }
 0x4e3   : > { %v1029_v40 = vsel %vm939_vm4, %v1024_v32, %v1026_v51 }
 0x4e4   : > { %v1035_v28 = vadd.f32 %v1029_v40, %v1006_v12 }
 0x4e6   : > { %v1053_v30 = vpop.permute.xlu0 %1052  ;;  %v1051_v3 = vpop.permute.xlu1 %1050 }
 0x4e7   : > { %v1057_v41 = vsel %vm1056_vm5, %v1049_v31, %v1051_v3  ;;  %v1058_v45 = vsel %vm1056_vm5, %v1051_v3, %v1053_v30 }
 0x4e8   : > { %v1063_v44 = vadd.f32 %v1057_v41, %v1033_v13  ;;  %v1064_v4 = vadd.f32 %v1058_v45, %v1034_v38 }
 0x4ea   : > { %v1079_v20 = vpop.permute.xlu0 %1078  ;;  %v1055_v46 = vpop.permute.xlu1 %1054 }
 0x4eb   : > { %v1059_v34 = vsel %vm1056_vm5, %v1053_v30, %v1055_v46 }
 0x4ec   : > { %v1065_v48 = vadd.f32 %v1059_v34, %v1035_v28 }
 0x4ee   : > { %v1083_v49 = vpop.permute.xlu0 %1082  ;;  %v1081_v11 = vpop.permute.xlu1 %1080 }
 0x4ef   : > { %v1086_v8 = vsel %vm1056_vm5, %v1079_v20, %v1081_v11  ;;  %v1087_v6 = vsel %vm1056_vm5, %v1081_v11, %v1083_v49 }
 0x4f0   : > { %v1092_v43 = vadd.f32 %v1086_v8, %v1063_v44  ;;  %v1093_v58 = vadd.f32 %v1087_v6, %v1064_v4 }
 0x4f2   : > { %v1108_v59 = vpop.permute.xlu0 %1107  ;;  %v1085_v14 = vpop.permute.xlu1 %1084 }
 0x4f3   : > { %v1088_v37 = vsel %vm1056_vm5, %v1083_v49, %v1085_v14 }
 0x4f4   : > { %v1094_v13 = vadd.f32 %v1088_v37, %v1065_v48 }
 0x4f6   : > { %v1112_v1 = vpop.permute.xlu0 %1111  ;;  %v1110_v29 = vpop.permute.xlu1 %1109 }
 0x4f7   : > { %v1115_v16 = vsel %vm1056_vm5, %v1108_v59, %v1110_v29  ;;  %v1116_v23 = vsel %vm1056_vm5, %v1110_v29, %v1112_v1 }
 0x4f8   : > { %v1121_v33 = vadd.f32 %v1115_v16, %v1092_v43  ;;  %v1122_v35 = vadd.f32 %v1116_v23, %v1093_v58 }
 0x4fa   : > { %v1137_v19 = vpop.permute.xlu0 %1136  ;;  %v1114_v56 = vpop.permute.xlu1 %1113 }
 0x4fb   : > { %v1117_v27 = vsel %vm1056_vm5, %v1112_v1, %v1114_v56 }
 0x4fc   : > { %v1123_v30 = vadd.f32 %v1117_v27, %v1094_v13 }
 0x4fe   : > { %v1141_v7 = vpop.permute.xlu0 %1140  ;;  %v1139_v22 = vpop.permute.xlu1 %1138 }
 0x4ff   : > { %v1144_v18 = vsel %vm1056_vm5, %v1137_v19, %v1139_v22  ;;  %v1145_v5 = vsel %vm1056_vm5, %v1139_v22, %v1141_v7 }
 0x500   : > { %v1150_v38 = vadd.f32 %v1144_v18, %v1121_v33  ;;  %v1151_v31 = vadd.f32 %v1145_v5, %v1122_v35 }
 0x502   : > { %v1166_v10 = vpop.permute.xlu0 %1165  ;;  %v1143_v17 = vpop.permute.xlu1 %1142 }
 0x503   : > { %v1146_v51 = vsel %vm1056_vm5, %v1141_v7, %v1143_v17 }
 0x504   : > { %v1152_v34 = vadd.f32 %v1146_v51, %v1123_v30 }
 0x506   : > { %v1170_v47 = vpop.permute.xlu0 %1169  ;;  %v1168_v39 = vpop.permute.xlu1 %1167 }
 0x507   : > { %v1174_v9 = vsel %vm1173_vm6, %v1166_v10, %v1168_v39  ;;  %v1175_v36 = vsel %vm1173_vm6, %v1168_v39, %v1170_v47 }
 0x508   : > { %v1180_v3 = vadd.f32 %v1174_v9, %v1150_v38  ;;  %v1181_v41 = vadd.f32 %v1175_v36, %v1151_v31 }
 0x50a   : > { %v1196_v2 = vpop.permute.xlu0 %1195  ;;  %v1172_v52 = vpop.permute.xlu1 %1171 }
 0x50b   : > { %v1176_v4 = vsel %vm1173_vm6, %v1170_v47, %v1172_v52 }
 0x50c   : > { %v1182_v59 = vadd.f32 %v1176_v4, %v1152_v34 }
 0x50e   : > { %v1200_v21 = vpop.permute.xlu0 %1199  ;;  %v1198_v26 = vpop.permute.xlu1 %1197 }
 0x50f   : > { %v1203_v40 = vsel %vm1173_vm6, %v1196_v2, %v1198_v26  ;;  %v1204_v28 = vsel %vm1173_vm6, %v1198_v26, %v1200_v21 }
 0x510   : > { %v1209_v48 = vadd.f32 %v1203_v40, %v1180_v3  ;;  %v1210_v49 = vadd.f32 %v1204_v28, %v1181_v41 }
 0x512   : > { %v1225_v42 = vpop.permute.xlu0 %1224  ;;  %v1202_v25 = vpop.permute.xlu1 %1201 }
 0x513   : > { %v1205_v11 = vsel %vm1173_vm6, %v1200_v21, %v1202_v25 }
 0x514   : > { %v1211_v10 = vadd.f32 %v1205_v11, %v1182_v59 }
 0x516   : > { %v1229_v61 = vpop.permute.xlu0 %1228  ;;  %v1227_v53 = vpop.permute.xlu1 %1226 }
 0x517   : > { %v1232_v20 = vsel %vm1173_vm6, %v1225_v42, %v1227_v53  ;;  %v1233_v46 = vsel %vm1173_vm6, %v1227_v53, %v1229_v61 }
 0x518   : > { %v1238_v14 = vadd.f32 %v1232_v20, %v1209_v48  ;;  %v1239_v1 = vadd.f32 %v1233_v46, %v1210_v49 }
 0x51a   : > { %v1254_v60 = vpop.permute.xlu0 %1253  ;;  %v1231_v62 = vpop.permute.xlu1 %1230 }
 0x51b   : > { %v1234_v56 = vsel %vm1173_vm6, %v1229_v61, %v1231_v62 }
 0x51c   : > { %v1240_v21 = vadd.f32 %v1234_v56, %v1211_v10 }
 0x51e   : > { %v1258_v50 = vpop.permute.xlu0 %1257  ;;  %v1256_v54 = vpop.permute.xlu1 %1255 }
 0x51f   : > { %v1261_v8 = vsel %vm1173_vm6, %v1254_v60, %v1256_v54  ;;  %v1262_v43 = vsel %vm1173_vm6, %v1256_v54, %v1258_v50 }
 0x520   : > { %v1267_v17 = vadd.f32 %v1261_v8, %v1238_v14  ;;  %v1268_v47 = vadd.f32 %v1262_v43, %v1239_v1 }
 0x522   : > { %v1283_v24 = vpop.permute.xlu0 %1282  ;;  %v1260_v15 = vpop.permute.xlu1 %1259 }
 0x523   : > { %v1263_v39 = vsel %vm1173_vm6, %v1258_v50, %v1260_v15 }
 0x524   : > { %v1269_v54 = vadd.f32 %v1263_v39, %v1240_v21 }
 0x526   : > { %v1287_v63 = vpop.permute.xlu0 %1286  ;;  %v1285_v57 = vpop.permute.xlu1 %1284 }
 0x527   : > { %v1291_v7 = vsel %vm1290_vm7, %v1283_v24, %v1285_v57  ;;  %v1292_v22 = vsel %vm1290_vm7, %v1285_v57, %v1287_v63 }
 0x528   : > { %v1297_v26 = vadd.f32 %v1291_v7, %v1267_v17  ;;  %v1298_v42 = vadd.f32 %v1292_v22, %v1268_v47 }
 0x52a   : > { %v1313_v0 = vpop.permute.xlu0 %1312  ;;  %v1289_v55 = vpop.permute.xlu1 %1288 }
 0x52b   : > { %v1293_v61 = vsel %vm1290_vm7, %v1287_v63, %v1289_v55 }
 0x52c   : > { %v1299_v15 = vadd.f32 %v1293_v61, %v1269_v54 }
 0x52e   : > { %v1317_v12 = vpop.permute.xlu0 %1316  ;;  %v1315_v32 = vpop.permute.xlu1 %1314 }
 0x52f   : > { %v1320_v2 = vsel %vm1290_vm7, %v1313_v0, %v1315_v32  ;;  %v1321_v52 = vsel %vm1290_vm7, %v1315_v32, %v1317_v12 }
 0x530   : > { %v1326_v24 = vadd.f32 %v1320_v2, %v1297_v26  ;;  %v1327_v57 = vadd.f32 %v1321_v52, %v1298_v42 }
 0x532   : > { %v1342_v45 = vpop.permute.xlu0 %1341  ;;  %v1319_v44 = vpop.permute.xlu1 %1318 }
 0x533   : > { %v1322_v50 = vsel %vm1290_vm7, %v1317_v12, %v1319_v44 }
 0x534   : > { %v1328_v55 = vadd.f32 %v1322_v50, %v1299_v15 }
 0x536   : > { %v1346_v29 = vpop.permute.xlu0 %1345  ;;  %v1344_v19 = vpop.permute.xlu1 %1343 }
 0x537   : > { %v1349_v60 = vsel %vm1290_vm7, %v1342_v45, %v1344_v19  ;;  %v1350_v62 = vsel %vm1290_vm7, %v1344_v19, %v1346_v29 }
 0x538   : > { %v1355_v6 = vadd.f32 %v1349_v60, %v1326_v24  ;;  %v1356_v0 = vadd.f32 %v1350_v62, %v1327_v57 }
 0x53a   : > { %v1371_v25 = vpop.permute.xlu0 %1370  ;;  %v1348_v53 = vpop.permute.xlu1 %1347 }
 0x53b   : > { %v1351_v58 = vsel %vm1290_vm7, %v1346_v29, %v1348_v53 }
 0x53c   : > { %v1357_v33 = vadd.f32 %v1351_v58, %v1328_v55 }
 0x53e   : > { %v1375_v16 = vpop.permute.xlu0 %1374  ;;  %v1373_v23 = vpop.permute.xlu1 %1372 }
 0x53f   : > { %v1378_v37 = vsel %vm1290_vm7, %v1371_v25, %v1373_v23  ;;  %v1379_v63 = vsel %vm1290_vm7, %v1373_v23, %v1375_v16 }
 0x540   : > { %v1384_v18 = vadd.f32 %v1378_v37, %v1355_v6  ;;  %v1385_v5 = vadd.f32 %v1379_v63, %v1356_v0 }
 0x542   : > { %v1473_v35 = vmul.f32 -1.442695, %v1384_v18  ;;  %v1474_v32 = vmul.f32 -1.442695, %v1385_v5  ;;  %v1377_v27 = vpop.permute.xlu1 %1376 }
 0x543   : > { %v1380_v12 = vsel %vm1290_vm7, %v1375_v16, %v1377_v27 }
 0x544   : > { %1570 = vpow2.f32 %v1473_v35  ;;  %v1386_v9 = vadd.f32 %v1380_v12, %v1357_v33 }
 0x545   : > { %1572 = vpow2.f32 %v1474_v32 }
 0x546   : > { %v1475_v36 = vmul.f32 -1.442695, %v1386_v9 }
 0x548   : > { %1574 = vpow2.f32 %v1475_v36 }
 0x551   : > { %v1571_v13 = vpop.eup %1570 }
 0x552   : > { %v1573_v38 = vpop.eup %1572  ;;  %v1396_v31 = vadd.f32 1.0, %v1571_v13 }
 0x553   : > { %v1397_v51 = vadd.f32 1.0, %v1573_v38 }
 0x554   : > { %1576 = vrcp.f32 %v1396_v31 }
 0x555   : > { %v1575_v40 = vpop.eup %1574  ;;  %1578 = vrcp.f32 %v1397_v51 }
 0x556   : > { %v1398_v28 = vadd.f32 1.0, %v1575_v40 }
 0x558   : > { %1580 = vrcp.f32 %v1398_v28 }
 0x561   : > { %v1577_v30 = vpop.eup %1576 }
 0x562   : > { %v1579_v3 = vpop.eup %1578 }
 0x563   : > { %v1407_v41 = vcombine.low %v1577_v30, %v1579_v3 }
 0x565   : > { %v1581_v45 = vpop.eup %1580  ;;  %1409 = vst [vmem:[%s143_s28] sm:$0x77] %v1407_v41 }
 0x566   : > { %1410 = vst [vmem:[%s143_s28 + $0x8] sm:$0x7] %v1581_v45 }
 0x567 PF: > { %s12_s9 = sadd.s32 1, %s1588_s9  }
 0x568   : > { %p9_p4 = scmp.ge.s32.totalorder %s12_s9, 4  }
 0x56a   :  { %11 = sbr.rel (!%p9_p4) target bundleno = 1 (0x1), region = 58 }

</bundles_post_ra>
